<compile_context>
chip_gen: v5e
topology: v5e:2x2
jax: 0.10.0
libtpu: 0.0.40
codegen_flags: <defaults>
</compile_context>

<pallas_src>
import random
from functools import partial

import jax
import jax.numpy as jnp
from jax.experimental import pallas as pl
from jax.experimental.pallas import tpu as pltpu

# ---------------------------------------------------------------------------
# Config (consistent with the module's __init__ shape logic)
# ---------------------------------------------------------------------------
CODEBOOK_SIZE = 64                      # self.net.codebook_size
NUM_QUANTIZERS = 4                      # self.net.num_quantizers
GROUPED_QUANTIZERS = 1                  # -> embedding_proj == Identity
DIM = 32                                # self.net.dim
NUM_SEMANTIC_TOKEN_IDS = 50
SEMANTIC_PAD_ID = -1
PAD_ID = -1
MASK_ID = CODEBOOK_SIZE                 # self.mask_id
NUM_CODES_WITH_MASK = CODEBOOK_SIZE + 1
NUM_EFF_Q = NUM_QUANTIZERS * GROUPED_QUANTIZERS
FFN_HIDDEN = 4 * DIM
LN_EPS = 1e-5
QD = NUM_EFF_Q * DIM                    # 128  (heads output width)
QL = NUM_EFF_Q * CODEBOOK_SIZE          # 256  (packed logits width, lane dense)

assert CODEBOOK_SIZE & (CODEBOOK_SIZE - 1) == 0, "power-of-2 codebook assumed"
_L_SHIFT = CODEBOOK_SIZE.bit_length() - 1           # log2(codebook_size)


# ---------------------------------------------------------------------------
# Fused Pallas kernel: backbone FFN -> heads(+folded w2) -> per-q LN + logits
#                      -> masked CE (all vectorized over the 128/256-lane tiles)
# ---------------------------------------------------------------------------
def _fused_kernel(x_ref, c_ref, lab_ref,
                  g1_ref, be1_ref, w1_ref, b1_ref,
                  hw_ref, wf_ref, bf_ref,
                  g2_ref, be2_ref, pavg_ref, lw_ref, lb_ref, ss_ref,
                  out_ref):
    D, L, Q = DIM, CODEBOOK_SIZE, NUM_EFF_Q

    # --- cond add + backbone stand-in (pre-LN FFN residual block) ------------
    # TODO(synk): real backbone NET_NAME_DICT[backbone_type] (and its use of
    # the padding mask) is not given; a single pre-LN FFN block is the stand-in.
    x = x_ref[...].astype(jnp.float32) + c_ref[...].astype(jnp.float32)   # (TM, D)
    mu = jnp.mean(x, axis=-1, keepdims=True)
    xc = x - mu
    var = jnp.mean(xc * xc, axis=-1, keepdims=True)
    xn = xc * jax.lax.rsqrt(var + LN_EPS) * g1_ref[...] + be1_ref[...]
    h = jnp.dot(xn.astype(jnp.bfloat16), w1_ref[...],
                preferred_element_type=jnp.float32) + b1_ref[...]         # (TM, 4D)
    h = jax.nn.gelu(h, approximate=True)  # TODO(synk): torch default GELU is exact (erf)

    # --- heads with the FFN down-projection folded in:
    #     e = (x + h@w2 + b2) @ hw + hb == x@hw + h@(w2@hw) + (b2@hw + hb) ----
    e = (jnp.dot(x.astype(jnp.bfloat16), hw_ref[...],
                 preferred_element_type=jnp.float32)
         + jnp.dot(h.astype(jnp.bfloat16), wf_ref[...],
                   preferred_element_type=jnp.float32)
         + bf_ref[...])                                                   # (TM, Q*D)

    # --- to_logits: per-quantizer LayerNorm vectorized across all Q*D lanes
    #     using block-diagonal 1/D averaging matmuls (MXU) instead of per-q
    #     slices / XLU reduces / concatenate -------------------------------
    mean_b = jnp.dot(e.astype(jnp.bfloat16), pavg_ref[...],
                     preferred_element_type=jnp.float32)                  # per-group mean
    ec = e - mean_b
    var_b = jnp.dot((ec * ec).astype(jnp.bfloat16), pavg_ref[...],
                    preferred_element_type=jnp.float32)                   # per-group var
    en = ec * jax.lax.rsqrt(var_b + LN_EPS) * g2_ref[...] + be2_ref[...]
    logits = jnp.dot(en.astype(jnp.bfloat16), lw_ref[...],
                     preferred_element_type=jnp.float32) + lb_ref[...]    # (TM, Q*L)

    # --- masked cross entropy, vectorized over all Q*L = 256 lanes ----------
    tm = logits.shape[0]
    lane = jax.lax.broadcasted_iota(jnp.int32, (tm, Q * L), 1)
    grp = lane >> _L_SHIFT                         # lane // L
    lane_in = lane & (L - 1)                       # lane %  L

    # per-quantizer max (stability) as sliced reduces, broadcast via selects
    m_cols = [jnp.max(logits[:, q * L:(q + 1) * L], axis=-1, keepdims=True)
              for q in range(Q)]
    m_b = m_cols[Q - 1]
    for q in range(Q - 2, -1, -1):
        m_b = jnp.where(grp == q, m_cols[q], m_b)

    pexp = jnp.exp(logits - m_b)                   # single 256-lane EUP pass
    # per-quantizer softmax denominators via block-broadcast indicator matmul
    sums_b = jnp.dot(pexp.astype(jnp.bfloat16), ss_ref[...],
                     preferred_element_type=jnp.float32)                  # (TM, Q*L)
    lse_b = jnp.log(sums_b) + m_b

    # labels come in pre-masked: label < 0  <=>  position is NOT in the CE mask
    lab4 = lab_ref[...]                                                   # (TM, Q) f32
    lab_b = lab4[:, Q - 1:Q]
    for q in range(Q - 2, -1, -1):
        lab_b = jnp.where(grp == q, lab4[:, q:q + 1], lab_b)
    onehot = lane_in.astype(jnp.float32) == lab_b

    ce_sum = jnp.sum(jnp.where(onehot, lse_b - logits, 0.0))
    w_sum = jnp.sum((lab4 >= 0.0).astype(jnp.float32))

    # lane-dense (1,1,128) partial-sum output: lane 0 = sum(ce), lane 1 = count
    lane_out = jax.lax.broadcasted_iota(jnp.int32, (1, 1, 128), 2)
    out_ref[...] = jnp.where(lane_out == 0, ce_sum,
                             jnp.where(lane_out == 1, w_sum, 0.0))


def _row_tile(m):
    # Single-step grid when M is small: the kernel is step-overhead bound and
    # v5e/v6e have a single TensorCore.  For larger M, split into a small even
    # number of big tiles so v7x's two TCs both get work ("parallel" axis).
    if m <= 512:
        return m
    for g in (2, 4, 8, 16, 32, 64):
        tm = m // g
        if m % g == 0 and tm <= 1024 and tm % 8 == 0:
            return tm
    # TODO(synk): for very large / non-divisible M, also set vmem_limit_bytes.
    return m


def fused_net_loss_partials(x_rows, cond_rows, enc_labels, p):
    """One pallas_call: backbone + heads + logits + masked-CE partial sums."""
    M, D = x_rows.shape
    TM = _row_tile(M)
    G = M // TM

    def wspec(shape):
        # Constant-index weight blocks (index map never changes across the grid).
        # TODO(synk): pipeline_mode=pl.Buffered(1) would drop the unused second
        # buffer; left at the default to keep the lowering maximally portable.
        return pl.BlockSpec(shape, lambda i: (0, 0))

    return pl.pallas_call(
        _fused_kernel,
        out_shape=jax.ShapeDtypeStruct((G, 1, 128), jnp.float32),
        grid=(G,),
        in_specs=[
            pl.BlockSpec((TM, D), lambda i: (i, 0)),            # summed code emb
            pl.BlockSpec((TM, D), lambda i: (i, 0)),            # cond
            pl.BlockSpec((TM, NUM_EFF_Q), lambda i: (i, 0)),    # masked labels (f32)
            wspec((1, D)), wspec((1, D)),                       # bb ln gamma / beta
            wspec((D, FFN_HIDDEN)), wspec((1, FFN_HIDDEN)),     # bb w1 (bf16) / b1
            wspec((D, QD)),                                     # heads w (bf16)
            wspec((FFN_HIDDEN, QD)), wspec((1, QD)),            # folded w2@hw / bias
            wspec((1, QD)), wspec((1, QD)),                     # logits ln g/b (tiled)
            wspec((QD, QD)),                                    # block-diag 1/D avg
            wspec((QD, QL)), wspec((1, QL)),                    # block-diag W / bias
            wspec((QL, QL)),                                    # segment-sum indicator
        ],
        out_specs=pl.BlockSpec((1, 1, 128), lambda i: (i, 0, 0)),
        compiler_params=pltpu.CompilerParams(dimension_semantics=("parallel",)),
    )(x_rows, cond_rows, enc_labels,
      p['bb_ln_g'], p['bb_ln_b'], p['bb_w1'], p['bb_b1'],
      p['heads_w'], p['heads_wfused'], p['heads_bfused'],
      p['logits_ln_g_tiled'], p['logits_ln_b_tiled'], p['pavg'],
      p['logits_wblk'], p['logits_bflat'], p['seg_bcast'])


# ---------------------------------------------------------------------------
# Parameters (deterministic init; matmul weights stored bf16; folds precomputed)
# ---------------------------------------------------------------------------
def init_params(key):
    ks = jax.random.split(key, 8)
    s = 0.02
    f32 = jnp.float32

    bb_w1 = s * jax.random.normal(ks[2], (DIM, FFN_HIDDEN), f32)
    bb_w2 = s * jax.random.normal(ks[3], (FFN_HIDDEN, DIM), f32)
    bb_b2 = jnp.zeros((1, DIM), f32)
    heads_w = s * jax.random.normal(ks[4], (DIM, QD), f32)
    heads_b = jnp.zeros((1, QD), f32)
    logits_w = s * jax.random.normal(ks[5], (NUM_EFF_Q, DIM, CODEBOOK_SIZE), f32)

    # block-diagonal packing of the per-quantizer EinMix weight: (Q*D, Q*L)
    wblk = jnp.zeros((QD, QL), f32)
    for q in range(NUM_EFF_Q):
        wblk = wblk.at[q * DIM:(q + 1) * DIM,
                       q * CODEBOOK_SIZE:(q + 1) * CODEBOOK_SIZE].set(logits_w[q])

    # algebraic fold of the FFN down-projection into the heads projection
    heads_wfused = bb_w2 @ heads_w                    # (FFN_HIDDEN, QD)
    heads_bfused = bb_b2 @ heads_w + heads_b          # (1, QD)

    ln2_g = jnp.ones((1, DIM), f32)
    ln2_b = jnp.zeros((1, DIM), f32)

    # block-diagonal 1/D averaging matrix (vectorized per-quantizer LayerNorm)
    pavg = jnp.kron(jnp.eye(NUM_EFF_Q, dtype=f32),
                    jnp.full((DIM, DIM), 1.0 / DIM, f32))
    # block-broadcast indicator for per-quantizer softmax denominators
    seg_bcast = jnp.kron(jnp.eye(NUM_EFF_Q, dtype=f32),
                         jnp.ones((CODEBOOK_SIZE, CODEBOOK_SIZE), f32))

    return {
        'code_embeds': s * jax.random.normal(
            ks[0], (NUM_CODES_WITH_MASK * NUM_EFF_Q, DIM), f32),
        'semantic_emb': s * jax.random.normal(
            ks[1], (NUM_SEMANTIC_TOKEN_IDS, DIM), f32),
        # backbone stand-in
        'bb_ln_g': jnp.ones((1, DIM), f32),
        'bb_ln_b': jnp.zeros((1, DIM), f32),
        'bb_w1': bb_w1.astype(jnp.bfloat16),
        'bb_b1': jnp.zeros((1, FFN_HIDDEN), f32),
        # heads (+ folded FFN down-projection)
        'heads_w': heads_w.astype(jnp.bfloat16),
        'heads_wfused': heads_wfused.astype(jnp.bfloat16),
        'heads_bfused': heads_bfused,
        # to_logits: LayerNorm(dim) (gamma/beta tiled across quantizer groups)
        'logits_ln_g_tiled': jnp.tile(ln2_g, (1, NUM_EFF_Q)),
        'logits_ln_b_tiled': jnp.tile(ln2_b, (1, NUM_EFF_Q)),
        'pavg': pavg.astype(jnp.bfloat16),
        'logits_wblk': wblk.astype(jnp.bfloat16),
        'logits_bflat': jnp.zeros((1, QL), f32),
        'seg_bcast': seg_bcast.astype(jnp.bfloat16),
    }


# ---------------------------------------------------------------------------
# Model glue (mirrors the PyTorch forward semantics) -- fully jittable
# ---------------------------------------------------------------------------
def get_condition(cond_ids, p):
    mask = cond_ids != SEMANTIC_PAD_ID
    ids = jnp.where(mask, cond_ids, 0)
    emb = jnp.take(p['semantic_emb'], ids, axis=0)
    return jnp.where(mask[..., None], emb, 0.0)


def get_mask_subset_prob(mask, prob, key, min_mask=0):
    prob = prob[:, None]
    num_to_mask = jnp.clip(
        mask.sum(axis=-1, keepdims=True).astype(jnp.float32) * prob,
        float(min_mask))
    logits = jax.random.uniform(key, mask.shape, dtype=jnp.float32)
    logits = jnp.where(mask, logits, -1.0)
    randperm = jnp.argsort(jnp.argsort(logits, axis=-1), axis=-1).astype(jnp.float32)
    num_padding = (~mask).sum(axis=-1, keepdims=True).astype(jnp.float32)
    randperm = randperm - num_padding
    subset_mask = randperm < num_to_mask
    subset_mask = jnp.where(mask, subset_mask, False)
    return subset_mask


def backbone_wrapper_loss(p, masked_flat, cond, enc_labels):
    """BackboneWrapper.forward + masked cross entropy, fused into one kernel."""
    B, NQ = masked_flat.shape
    N = NQ // NUM_EFF_Q
    M = B * N
    offsets = jnp.arange(NUM_EFF_Q, dtype=jnp.int32) * NUM_CODES_WITH_MASK
    ids = masked_flat.reshape(B, N, NUM_EFF_Q) + offsets
    # TODO(synk): PAD_ID(-1) tokens would index out of range in PyTorch; here
    # jnp.take clips -- such positions are zero-weighted in the loss anyway.
    code_emb = jnp.take(p['code_embeds'], ids, axis=0)          # (B, N, Q, D)
    summed = code_emb.sum(axis=2)                               # reduce over q (g=1)
    # embedding_proj == Identity (grouped_quantizers == 1)
    partials = fused_net_loss_partials(
        summed.reshape(M, DIM), cond.reshape(M, DIM), enc_labels, p)
    ce_total = partials[:, 0, 0].sum()
    w_total = partials[:, 0, 1].sum()
    # TODO(synk): PyTorch F.cross_entropy over an empty selection is NaN; the
    # max(.,1) guard returns 0 for that edge case instead.
    return ce_total / jnp.maximum(w_total, 1.0)


@partial(jax.jit, static_argnums=(4, 5))
def soundstorm_forward(p, x, cond_ids, key, t, q_lvl):
    B, N, Q = x.shape
    seq_mask = jnp.ones((B, N), dtype=bool)
    if PAD_ID is not None:
        pad_mask = (x == PAD_ID).any(axis=-1)
        seq_mask = seq_mask & ~pad_mask

    cond_tokens = get_condition(cond_ids, p)                     # (B, N, D)

    k1, k2 = jax.random.split(key)
    mask_sub = seq_mask[:, t:]
    rand_times = jax.random.uniform(k1, (B,), dtype=jnp.float32)
    rand_probs = 1.0 - rand_times                                # linear_schedule
    mask_sub = get_mask_subset_prob(mask_sub, rand_probs, k2)

    masked_col = jnp.where(mask_sub, MASK_ID, x[:, t:, q_lvl])
    masked_col = jnp.concatenate([x[:, :t, q_lvl], masked_col], axis=1)[..., None]
    masked = jnp.concatenate([x[:, :, :q_lvl], masked_col, x[:, :, q_lvl + 1:]],
                             axis=2)
    masked = masked.at[:, t:, q_lvl + 1:].set(MASK_ID)
    masked_flat = masked.reshape(B, N * Q)

    prompt_mask = jnp.zeros((B, t), dtype=bool)
    lower = jnp.zeros((B, N, q_lvl), dtype=bool)
    upper = jnp.ones((B, N, Q - q_lvl - 1), dtype=bool)
    upper = upper.at[:, :t, :].set(False)
    mask_full = jnp.concatenate([prompt_mask, mask_sub], axis=1)[..., None]
    mask_full = jnp.concatenate([lower, mask_full, upper], axis=2)
    mask_full = mask_full.at[:, :, q_lvl + 1:].set(False)        # (B, N, Q)

    M = B * N
    labels = x.reshape(M, Q).astype(jnp.float32)                 # orig_seq per (b,n,q)
    weights = mask_full.reshape(M, Q)
    # single side input: label >= 0 exactly where the CE mask is True
    enc_labels = jnp.where(weights, labels, -1.0)

    # F.cross_entropy(logits[mask], orig[mask]) == masked mean of per-token CE
    return backbone_wrapper_loss(p, masked_flat, cond_tokens, enc_labels)


# ---------------------------------------------------------------------------
if __name__ == "__main__":
    key = jax.random.PRNGKey(0)
    kp, kx, kc, kfwd = jax.random.split(key, 4)
    params = init_params(kp)

    B, N = 2, 16
    x = jax.random.randint(kx, (B, N, NUM_QUANTIZERS), 0, CODEBOOK_SIZE,
                           dtype=jnp.int32)
    cond_ids = jax.random.randint(kc, (B, N), 0, NUM_SEMANTIC_TOKEN_IDS,
                                  dtype=jnp.int32)
    cond_ids = cond_ids.at[0, -2:].set(SEMANTIC_PAD_ID)  # exercise semantic pad path

    # Host-side draw of t / q_lvl (mirrors torch randrange; keeps forward jittable).
    seq_mask_host = jnp.ones((B, N), dtype=bool)
    if PAD_ID is not None:
        seq_mask_host = seq_mask_host & ~(x == PAD_ID).any(axis=-1)
    min_seq_len = int(jnp.min(jnp.sum(seq_mask_host, axis=-1)))
    rng = random.Random(0)                     # deterministic stand-in for randrange
    t = rng.randrange(0, min_seq_len - 1)
    q_lvl = rng.randrange(0, NUM_QUANTIZERS)

    loss = soundstorm_forward(params, x, cond_ids, kfwd, t, q_lvl)
    jax.block_until_ready(loss)
    assert loss.shape == () and bool(jnp.isfinite(loss))
    print("KERNEL_OK")
</pallas_src>

<mosaic_0001>
module attributes {stable_mosaic.version = 11 : i64} {
  func.func @_fused_kernel(%arg0: i32, %arg1: memref<32x32xf32, #tpu.memory_space<vmem>>, %arg2: memref<32x32xf32, #tpu.memory_space<vmem>>, %arg3: memref<32x4xf32, #tpu.memory_space<vmem>>, %arg4: memref<1x32xf32, #tpu.memory_space<vmem>>, %arg5: memref<1x32xf32, #tpu.memory_space<vmem>>, %arg6: memref<32x128xbf16, #tpu.memory_space<vmem>>, %arg7: memref<1x128xf32, #tpu.memory_space<vmem>>, %arg8: memref<32x128xbf16, #tpu.memory_space<vmem>>, %arg9: memref<128x128xbf16, #tpu.memory_space<vmem>>, %arg10: memref<1x128xf32, #tpu.memory_space<vmem>>, %arg11: memref<1x128xf32, #tpu.memory_space<vmem>>, %arg12: memref<1x128xf32, #tpu.memory_space<vmem>>, %arg13: memref<128x128xbf16, #tpu.memory_space<vmem>>, %arg14: memref<128x256xbf16, #tpu.memory_space<vmem>>, %arg15: memref<1x256xf32, #tpu.memory_space<vmem>>, %arg16: memref<256x256xbf16, #tpu.memory_space<vmem>>, %arg17: memref<1x1x128xf32, #tpu.memory_space<vmem>>) attributes {dimension_semantics = [#tpu.dimension_semantics<parallel>], iteration_bounds = array<i64: 1>, scalar_prefetch = 0 : i64, scratch_operands = 0 : i64, tpu.core_type = #tpu.core_type<tc>, window_params = [{transform_indices = @transform_0, window_bounds = array<i64: 32, 32>}, {transform_indices = @transform_1, window_bounds = array<i64: 32, 32>}, {transform_indices = @transform_2, window_bounds = array<i64: 32, 4>}, {pipeline_mode = #tpu.pipeline_mode<synchronous>, transform_indices = @transform_3, window_bounds = array<i64: 1, 32>}, {pipeline_mode = #tpu.pipeline_mode<synchronous>, transform_indices = @transform_4, window_bounds = array<i64: 1, 32>}, {pipeline_mode = #tpu.pipeline_mode<synchronous>, transform_indices = @transform_5, window_bounds = array<i64: 32, 128>}, {pipeline_mode = #tpu.pipeline_mode<synchronous>, transform_indices = @transform_6, window_bounds = array<i64: 1, 128>}, {pipeline_mode = #tpu.pipeline_mode<synchronous>, transform_indices = @transform_7, window_bounds = array<i64: 32, 128>}, {pipeline_mode = #tpu.pipeline_mode<synchronous>, transform_indices = @transform_8, window_bounds = array<i64: 128, 128>}, {pipeline_mode = #tpu.pipeline_mode<synchronous>, transform_indices = @transform_9, window_bounds = array<i64: 1, 128>}, {pipeline_mode = #tpu.pipeline_mode<synchronous>, transform_indices = @transform_10, window_bounds = array<i64: 1, 128>}, {pipeline_mode = #tpu.pipeline_mode<synchronous>, transform_indices = @transform_11, window_bounds = array<i64: 1, 128>}, {pipeline_mode = #tpu.pipeline_mode<synchronous>, transform_indices = @transform_12, window_bounds = array<i64: 128, 128>}, {pipeline_mode = #tpu.pipeline_mode<synchronous>, transform_indices = @transform_13, window_bounds = array<i64: 128, 256>}, {pipeline_mode = #tpu.pipeline_mode<synchronous>, transform_indices = @transform_14, window_bounds = array<i64: 1, 256>}, {pipeline_mode = #tpu.pipeline_mode<synchronous>, transform_indices = @transform_15, window_bounds = array<i64: 256, 256>}, {transform_indices = @transform_16, window_bounds = array<i64: 1, 1, 128>}]} {
    %c0 = arith.constant 0 : index
    %c0_0 = arith.constant 0 : index
    %0 = vector.load %arg1[%c0, %c0_0] : memref<32x32xf32, #tpu.memory_space<vmem>>, vector<32x32xf32>
    %c0_1 = arith.constant 0 : index
    %c0_2 = arith.constant 0 : index
    %1 = vector.load %arg2[%c0_1, %c0_2] : memref<32x32xf32, #tpu.memory_space<vmem>>, vector<32x32xf32>
    %2 = arith.addf %0, %1 : vector<32x32xf32>
    %cst = arith.constant dense<0.000000e+00> : vector<32xf32>
    %3 = vector.multi_reduction <add>, %2, %cst [1] : vector<32x32xf32> to vector<32xf32>
    %4 = vector.shape_cast %3 : vector<32xf32> to vector<32x1xf32>
    %cst_3 = arith.constant 3.200000e+01 : f32
    %5 = vector.broadcast %cst_3 : f32 to vector<32x1xf32>
    %6 = arith.divf %4, %5 : vector<32x1xf32>
    %7 = vector.broadcast %6 : vector<32x1xf32> to vector<32x32xf32>
    %8 = arith.subf %2, %7 : vector<32x32xf32>
    %9 = arith.mulf %8, %8 : vector<32x32xf32>
    %cst_4 = arith.constant dense<0.000000e+00> : vector<32xf32>
    %10 = vector.multi_reduction <add>, %9, %cst_4 [1] : vector<32x32xf32> to vector<32xf32>
    %11 = vector.shape_cast %10 : vector<32xf32> to vector<32x1xf32>
    %cst_5 = arith.constant 3.200000e+01 : f32
    %12 = vector.broadcast %cst_5 : f32 to vector<32x1xf32>
    %13 = arith.divf %11, %12 : vector<32x1xf32>
    %cst_6 = arith.constant 9.99999974E-6 : f32
    %14 = vector.broadcast %cst_6 : f32 to vector<32x1xf32>
    %15 = arith.addf %13, %14 : vector<32x1xf32>
    %16 = math.rsqrt %15 : vector<32x1xf32>
    %17 = vector.broadcast %16 : vector<32x1xf32> to vector<32x32xf32>
    %18 = arith.mulf %8, %17 : vector<32x32xf32>
    %c0_7 = arith.constant 0 : index
    %c0_8 = arith.constant 0 : index
    %19 = vector.load %arg4[%c0_7, %c0_8] : memref<1x32xf32, #tpu.memory_space<vmem>>, vector<1x32xf32>
    %20 = vector.broadcast %19 : vector<1x32xf32> to vector<32x32xf32>
    %21 = arith.mulf %18, %20 : vector<32x32xf32>
    %c0_9 = arith.constant 0 : index
    %c0_10 = arith.constant 0 : index
    %22 = vector.load %arg5[%c0_9, %c0_10] : memref<1x32xf32, #tpu.memory_space<vmem>>, vector<1x32xf32>
    %23 = vector.broadcast %22 : vector<1x32xf32> to vector<32x32xf32>
    %24 = arith.addf %21, %23 : vector<32x32xf32>
    %25 = arith.truncf %24 : vector<32x32xf32> to vector<32x32xbf16>
    %c0_11 = arith.constant 0 : index
    %c0_12 = arith.constant 0 : index
    %26 = vector.load %arg6[%c0_11, %c0_12] : memref<32x128xbf16, #tpu.memory_space<vmem>>, vector<32x128xbf16>
    %cst_13 = arith.constant dense<0.000000e+00> : vector<32x128xf32>
    %27 = tpu.matmul %25, %26, %cst_13 {dimension_numbers = #tpu.dot_dimension_numbers<[1], [0], [0], [1], [0, 0, 1, 1], [], []>} : vector<32x32xbf16>, vector<32x128xbf16>, vector<32x128xf32> -> vector<32x128xf32>
    %c0_14 = arith.constant 0 : index
    %c0_15 = arith.constant 0 : index
    %28 = vector.load %arg7[%c0_14, %c0_15] : memref<1x128xf32, #tpu.memory_space<vmem>>, vector<1x128xf32>
    %29 = vector.broadcast %28 : vector<1x128xf32> to vector<32x128xf32>
    %30 = arith.addf %27, %29 : vector<32x128xf32>
    %31 = arith.mulf %30, %30 : vector<32x128xf32>
    %32 = arith.mulf %30, %31 : vector<32x128xf32>
    %cst_16 = arith.constant 4.471500e-02 : f32
    %33 = vector.broadcast %cst_16 : f32 to vector<32x128xf32>
    %34 = arith.mulf %33, %32 : vector<32x128xf32>
    %35 = arith.addf %30, %34 : vector<32x128xf32>
    %cst_17 = arith.constant 0.797884583 : f32
    %36 = vector.broadcast %cst_17 : f32 to vector<32x128xf32>
    %37 = arith.mulf %36, %35 : vector<32x128xf32>
    %38 = math.tanh %37 : vector<32x128xf32>
    %cst_18 = arith.constant 1.000000e+00 : f32
    %39 = vector.broadcast %cst_18 : f32 to vector<32x128xf32>
    %40 = arith.addf %39, %38 : vector<32x128xf32>
    %cst_19 = arith.constant 5.000000e-01 : f32
    %41 = vector.broadcast %cst_19 : f32 to vector<32x128xf32>
    %42 = arith.mulf %41, %40 : vector<32x128xf32>
    %43 = arith.mulf %30, %42 : vector<32x128xf32>
    %44 = arith.truncf %2 : vector<32x32xf32> to vector<32x32xbf16>
    %c0_20 = arith.constant 0 : index
    %c0_21 = arith.constant 0 : index
    %45 = vector.load %arg8[%c0_20, %c0_21] : memref<32x128xbf16, #tpu.memory_space<vmem>>, vector<32x128xbf16>
    %cst_22 = arith.constant dense<0.000000e+00> : vector<32x128xf32>
    %46 = tpu.matmul %44, %45, %cst_22 {dimension_numbers = #tpu.dot_dimension_numbers<[1], [0], [0], [1], [0, 0, 1, 1], [], []>} : vector<32x32xbf16>, vector<32x128xbf16>, vector<32x128xf32> -> vector<32x128xf32>
    %47 = arith.truncf %43 : vector<32x128xf32> to vector<32x128xbf16>
    %c0_23 = arith.constant 0 : index
    %c0_24 = arith.constant 0 : index
    %48 = vector.load %arg9[%c0_23, %c0_24] : memref<128x128xbf16, #tpu.memory_space<vmem>>, vector<128x128xbf16>
    %cst_25 = arith.constant dense<0.000000e+00> : vector<32x128xf32>
    %49 = tpu.matmul %47, %48, %cst_25 {dimension_numbers = #tpu.dot_dimension_numbers<[1], [0], [0], [1], [0, 0, 1, 1], [], []>} : vector<32x128xbf16>, vector<128x128xbf16>, vector<32x128xf32> -> vector<32x128xf32>
    %50 = arith.addf %46, %49 : vector<32x128xf32>
    %c0_26 = arith.constant 0 : index
    %c0_27 = arith.constant 0 : index
    %51 = vector.load %arg10[%c0_26, %c0_27] : memref<1x128xf32, #tpu.memory_space<vmem>>, vector<1x128xf32>
    %52 = vector.broadcast %51 : vector<1x128xf32> to vector<32x128xf32>
    %53 = arith.addf %50, %52 : vector<32x128xf32>
    %54 = arith.truncf %53 : vector<32x128xf32> to vector<32x128xbf16>
    %c0_28 = arith.constant 0 : index
    %c0_29 = arith.constant 0 : index
    %55 = vector.load %arg13[%c0_28, %c0_29] : memref<128x128xbf16, #tpu.memory_space<vmem>>, vector<128x128xbf16>
    %cst_30 = arith.constant dense<0.000000e+00> : vector<32x128xf32>
    %56 = tpu.matmul %54, %55, %cst_30 {dimension_numbers = #tpu.dot_dimension_numbers<[1], [0], [0], [1], [0, 0, 1, 1], [], []>} : vector<32x128xbf16>, vector<128x128xbf16>, vector<32x128xf32> -> vector<32x128xf32>
    %57 = arith.subf %53, %56 : vector<32x128xf32>
    %58 = arith.mulf %57, %57 : vector<32x128xf32>
    %59 = arith.truncf %58 : vector<32x128xf32> to vector<32x128xbf16>
    %c0_31 = arith.constant 0 : index
    %c0_32 = arith.constant 0 : index
    %60 = vector.load %arg13[%c0_31, %c0_32] : memref<128x128xbf16, #tpu.memory_space<vmem>>, vector<128x128xbf16>
    %cst_33 = arith.constant dense<0.000000e+00> : vector<32x128xf32>
    %61 = tpu.matmul %59, %60, %cst_33 {dimension_numbers = #tpu.dot_dimension_numbers<[1], [0], [0], [1], [0, 0, 1, 1], [], []>} : vector<32x128xbf16>, vector<128x128xbf16>, vector<32x128xf32> -> vector<32x128xf32>
    %cst_34 = arith.constant 9.99999974E-6 : f32
    %62 = vector.broadcast %cst_34 : f32 to vector<32x128xf32>
    %63 = arith.addf %61, %62 : vector<32x128xf32>
    %64 = math.rsqrt %63 : vector<32x128xf32>
    %65 = arith.mulf %57, %64 : vector<32x128xf32>
    %c0_35 = arith.constant 0 : index
    %c0_36 = arith.constant 0 : index
    %66 = vector.load %arg11[%c0_35, %c0_36] : memref<1x128xf32, #tpu.memory_space<vmem>>, vector<1x128xf32>
    %67 = vector.broadcast %66 : vector<1x128xf32> to vector<32x128xf32>
    %68 = arith.mulf %65, %67 : vector<32x128xf32>
    %c0_37 = arith.constant 0 : index
    %c0_38 = arith.constant 0 : index
    %69 = vector.load %arg12[%c0_37, %c0_38] : memref<1x128xf32, #tpu.memory_space<vmem>>, vector<1x128xf32>
    %70 = vector.broadcast %69 : vector<1x128xf32> to vector<32x128xf32>
    %71 = arith.addf %68, %70 : vector<32x128xf32>
    %72 = arith.truncf %71 : vector<32x128xf32> to vector<32x128xbf16>
    %c0_39 = arith.constant 0 : index
    %c0_40 = arith.constant 0 : index
    %73 = vector.load %arg14[%c0_39, %c0_40] : memref<128x256xbf16, #tpu.memory_space<vmem>>, vector<128x256xbf16>
    %cst_41 = arith.constant dense<0.000000e+00> : vector<32x256xf32>
    %74 = tpu.matmul %72, %73, %cst_41 {dimension_numbers = #tpu.dot_dimension_numbers<[1], [0], [0], [1], [0, 0, 1, 1], [], []>} : vector<32x128xbf16>, vector<128x256xbf16>, vector<32x256xf32> -> vector<32x256xf32>
    %c0_42 = arith.constant 0 : index
    %c0_43 = arith.constant 0 : index
    %75 = vector.load %arg15[%c0_42, %c0_43] : memref<1x256xf32, #tpu.memory_space<vmem>>, vector<1x256xf32>
    %76 = vector.broadcast %75 : vector<1x256xf32> to vector<32x256xf32>
    %77 = arith.addf %74, %76 : vector<32x256xf32>
    %78 = tpu.iota {dimensions = array<i32: 1>} : vector<32x256xi32>
    %c6_i32 = arith.constant 6 : i32
    %79 = vector.broadcast %c6_i32 : i32 to vector<32x256xi32>
    %80 = arith.shrsi %78, %79 : vector<32x256xi32>
    %c63_i32 = arith.constant 63 : i32
    %81 = vector.broadcast %c63_i32 : i32 to vector<32x256xi32>
    %82 = arith.andi %78, %81 : vector<32x256xi32>
    %83 = vector.extract_strided_slice %77 {offsets = [0, 0], sizes = [32, 64], strides = [1, 1]} : vector<32x256xf32> to vector<32x64xf32>
    %cst_44 = arith.constant dense<0xFF800000> : vector<32xf32>
    %84 = vector.multi_reduction <maximumf>, %83, %cst_44 [1] : vector<32x64xf32> to vector<32xf32>
    %85 = vector.shape_cast %84 : vector<32xf32> to vector<32x1xf32>
    %86 = vector.extract_strided_slice %77 {offsets = [0, 64], sizes = [32, 64], strides = [1, 1]} : vector<32x256xf32> to vector<32x64xf32>
    %cst_45 = arith.constant dense<0xFF800000> : vector<32xf32>
    %87 = vector.multi_reduction <maximumf>, %86, %cst_45 [1] : vector<32x64xf32> to vector<32xf32>
    %88 = vector.shape_cast %87 : vector<32xf32> to vector<32x1xf32>
    %89 = vector.extract_strided_slice %77 {offsets = [0, 128], sizes = [32, 64], strides = [1, 1]} : vector<32x256xf32> to vector<32x64xf32>
    %cst_46 = arith.constant dense<0xFF800000> : vector<32xf32>
    %90 = vector.multi_reduction <maximumf>, %89, %cst_46 [1] : vector<32x64xf32> to vector<32xf32>
    %91 = vector.shape_cast %90 : vector<32xf32> to vector<32x1xf32>
    %92 = vector.extract_strided_slice %77 {offsets = [0, 192], sizes = [32, 64], strides = [1, 1]} : vector<32x256xf32> to vector<32x64xf32>
    %cst_47 = arith.constant dense<0xFF800000> : vector<32xf32>
    %93 = vector.multi_reduction <maximumf>, %92, %cst_47 [1] : vector<32x64xf32> to vector<32xf32>
    %94 = vector.shape_cast %93 : vector<32xf32> to vector<32x1xf32>
    %c2_i32 = arith.constant 2 : i32
    %95 = vector.broadcast %c2_i32 : i32 to vector<32x256xi32>
    %96 = arith.cmpi eq, %80, %95 : vector<32x256xi32>
    %97 = vector.shape_cast %91 : vector<32x1xf32> to vector<32x1xf32>
    %98 = vector.broadcast %97 : vector<32x1xf32> to vector<32x256xf32>
    %99 = vector.shape_cast %94 : vector<32x1xf32> to vector<32x1xf32>
    %100 = vector.broadcast %99 : vector<32x1xf32> to vector<32x256xf32>
    %101 = arith.select %96, %98, %100 : vector<32x256xi1>, vector<32x256xf32>
    %c1_i32 = arith.constant 1 : i32
    %102 = vector.broadcast %c1_i32 : i32 to vector<32x256xi32>
    %103 = arith.cmpi eq, %80, %102 : vector<32x256xi32>
    %104 = vector.shape_cast %88 : vector<32x1xf32> to vector<32x1xf32>
    %105 = vector.broadcast %104 : vector<32x1xf32> to vector<32x256xf32>
    %106 = arith.select %103, %105, %101 : vector<32x256xi1>, vector<32x256xf32>
    %c0_i32 = arith.constant 0 : i32
    %107 = vector.broadcast %c0_i32 : i32 to vector<32x256xi32>
    %108 = arith.cmpi eq, %80, %107 : vector<32x256xi32>
    %109 = vector.shape_cast %85 : vector<32x1xf32> to vector<32x1xf32>
    %110 = vector.broadcast %109 : vector<32x1xf32> to vector<32x256xf32>
    %111 = arith.select %108, %110, %106 : vector<32x256xi1>, vector<32x256xf32>
    %112 = arith.subf %77, %111 : vector<32x256xf32>
    %113 = math.exp %112 : vector<32x256xf32>
    %114 = arith.truncf %113 : vector<32x256xf32> to vector<32x256xbf16>
    %c0_48 = arith.constant 0 : index
    %c0_49 = arith.constant 0 : index
    %115 = vector.load %arg16[%c0_48, %c0_49] : memref<256x256xbf16, #tpu.memory_space<vmem>>, vector<256x256xbf16>
    %cst_50 = arith.constant dense<0.000000e+00> : vector<32x256xf32>
    %116 = tpu.matmul %114, %115, %cst_50 {dimension_numbers = #tpu.dot_dimension_numbers<[1], [0], [0], [1], [0, 0, 1, 1], [], []>} : vector<32x256xbf16>, vector<256x256xbf16>, vector<32x256xf32> -> vector<32x256xf32>
    %117 = math.log %116 : vector<32x256xf32>
    %118 = arith.addf %117, %111 : vector<32x256xf32>
    %c0_51 = arith.constant 0 : index
    %c0_52 = arith.constant 0 : index
    %119 = vector.load %arg3[%c0_51, %c0_52] : memref<32x4xf32, #tpu.memory_space<vmem>>, vector<32x4xf32>
    %120 = vector.extract_strided_slice %119 {offsets = [0, 3], sizes = [32, 1], strides = [1, 1]} : vector<32x4xf32> to vector<32x1xf32>
    %c2_i32_53 = arith.constant 2 : i32
    %121 = vector.broadcast %c2_i32_53 : i32 to vector<32x256xi32>
    %122 = arith.cmpi eq, %80, %121 : vector<32x256xi32>
    %123 = vector.extract_strided_slice %119 {offsets = [0, 2], sizes = [32, 1], strides = [1, 1]} : vector<32x4xf32> to vector<32x1xf32>
    %124 = vector.shape_cast %123 : vector<32x1xf32> to vector<32x1xf32>
    %125 = vector.broadcast %124 : vector<32x1xf32> to vector<32x256xf32>
    %126 = vector.shape_cast %120 : vector<32x1xf32> to vector<32x1xf32>
    %127 = vector.broadcast %126 : vector<32x1xf32> to vector<32x256xf32>
    %128 = arith.select %122, %125, %127 : vector<32x256xi1>, vector<32x256xf32>
    %c1_i32_54 = arith.constant 1 : i32
    %129 = vector.broadcast %c1_i32_54 : i32 to vector<32x256xi32>
    %130 = arith.cmpi eq, %80, %129 : vector<32x256xi32>
    %131 = vector.extract_strided_slice %119 {offsets = [0, 1], sizes = [32, 1], strides = [1, 1]} : vector<32x4xf32> to vector<32x1xf32>
    %132 = vector.shape_cast %131 : vector<32x1xf32> to vector<32x1xf32>
    %133 = vector.broadcast %132 : vector<32x1xf32> to vector<32x256xf32>
    %134 = arith.select %130, %133, %128 : vector<32x256xi1>, vector<32x256xf32>
    %c0_i32_55 = arith.constant 0 : i32
    %135 = vector.broadcast %c0_i32_55 : i32 to vector<32x256xi32>
    %136 = arith.cmpi eq, %80, %135 : vector<32x256xi32>
    %137 = vector.extract_strided_slice %119 {offsets = [0, 0], sizes = [32, 1], strides = [1, 1]} : vector<32x4xf32> to vector<32x1xf32>
    %138 = vector.shape_cast %137 : vector<32x1xf32> to vector<32x1xf32>
    %139 = vector.broadcast %138 : vector<32x1xf32> to vector<32x256xf32>
    %140 = arith.select %136, %139, %134 : vector<32x256xi1>, vector<32x256xf32>
    %141 = arith.sitofp %82 : vector<32x256xi32> to vector<32x256xf32>
    %142 = arith.cmpf oeq, %141, %140 : vector<32x256xf32>
    %143 = arith.subf %118, %77 : vector<32x256xf32>
    %cst_56 = arith.constant 0.000000e+00 : f32
    %144 = vector.broadcast %cst_56 : f32 to vector<32x256xf32>
    %145 = arith.select %142, %143, %144 : vector<32x256xi1>, vector<32x256xf32>
    %146 = vector.shape_cast %145 : vector<32x256xf32> to vector<1x32x256xf32>
    %cst_57 = arith.constant dense<0.000000e+00> : vector<1xf32>
    %147 = vector.multi_reduction <add>, %146, %cst_57 [1, 2] : vector<1x32x256xf32> to vector<1xf32>
    %148 = vector.shape_cast %147 : vector<1xf32> to vector<1x1x1xf32>
    %149 = vector.extract %148[0, 0, 0] : f32 from vector<1x1x1xf32>
    %cst_58 = arith.constant 0.000000e+00 : f32
    %150 = vector.broadcast %cst_58 : f32 to vector<32x4xf32>
    %151 = arith.cmpf oge, %119, %150 : vector<32x4xf32>
    %152 = arith.extui %151 : vector<32x4xi1> to vector<32x4xi32>
    %153 = arith.sitofp %152 : vector<32x4xi32> to vector<32x4xf32>
    %154 = vector.shape_cast %153 : vector<32x4xf32> to vector<1x32x4xf32>
    %cst_59 = arith.constant dense<0.000000e+00> : vector<1xf32>
    %155 = vector.multi_reduction <add>, %154, %cst_59 [1, 2] : vector<1x32x4xf32> to vector<1xf32>
    %156 = vector.shape_cast %155 : vector<1xf32> to vector<1x1x1xf32>
    %157 = vector.extract %156[0, 0, 0] : f32 from vector<1x1x1xf32>
    %158 = tpu.iota {dimensions = array<i32: 2>} : vector<1x1x128xi32>
    %c0_i32_60 = arith.constant 0 : i32
    %159 = vector.broadcast %c0_i32_60 : i32 to vector<1x1x128xi32>
    %160 = arith.cmpi eq, %158, %159 : vector<1x1x128xi32>
    %c1_i32_61 = arith.constant 1 : i32
    %161 = vector.broadcast %c1_i32_61 : i32 to vector<1x1x128xi32>
    %162 = arith.cmpi eq, %158, %161 : vector<1x1x128xi32>
    %cst_62 = arith.constant 0.000000e+00 : f32
    %163 = vector.broadcast %157 : f32 to vector<1x1x128xf32>
    %164 = vector.broadcast %cst_62 : f32 to vector<1x1x128xf32>
    %165 = arith.select %162, %163, %164 : vector<1x1x128xi1>, vector<1x1x128xf32>
    %166 = vector.broadcast %149 : f32 to vector<1x1x128xf32>
    %167 = arith.select %160, %166, %165 : vector<1x1x128xi1>, vector<1x1x128xf32>
    %c0_63 = arith.constant 0 : index
    %c0_64 = arith.constant 0 : index
    %c0_65 = arith.constant 0 : index
    %168 = vector.load %arg17[%c0_63, %c0_64, %c0_65] : memref<1x1x128xf32, #tpu.memory_space<vmem>>, vector<1x1x128xf32>
    tpu.vector_store %arg17[%c0_63, %c0_64, %c0_65], %167 {strides = array<i32>} : memref<1x1x128xf32, #tpu.memory_space<vmem>>, vector<1x1x128xf32>,
    return
  }
  func.func @transform_0(%arg0: i32) -> (i32, i32) {
    %c0_i32 = arith.constant 0 : i32
    %c0_i32_0 = arith.constant 0 : i32
    return %arg0, %c0_i32 : i32, i32
  }
  func.func @transform_1(%arg0: i32) -> (i32, i32) {
    %c0_i32 = arith.constant 0 : i32
    %c0_i32_0 = arith.constant 0 : i32
    return %arg0, %c0_i32 : i32, i32
  }
  func.func @transform_2(%arg0: i32) -> (i32, i32) {
    %c0_i32 = arith.constant 0 : i32
    %c0_i32_0 = arith.constant 0 : i32
    return %arg0, %c0_i32 : i32, i32
  }
  func.func @transform_3(%arg0: i32) -> (i32, i32) {
    %c0_i32 = arith.constant 0 : i32
    %c0_i32_0 = arith.constant 0 : i32
    %c0_i32_1 = arith.constant 0 : i32
    return %c0_i32, %c0_i32_0 : i32, i32
  }
  func.func @transform_4(%arg0: i32) -> (i32, i32) {
    %c0_i32 = arith.constant 0 : i32
    %c0_i32_0 = arith.constant 0 : i32
    %c0_i32_1 = arith.constant 0 : i32
    return %c0_i32, %c0_i32_0 : i32, i32
  }
  func.func @transform_5(%arg0: i32) -> (i32, i32) {
    %c0_i32 = arith.constant 0 : i32
    %c0_i32_0 = arith.constant 0 : i32
    %c0_i32_1 = arith.constant 0 : i32
    return %c0_i32, %c0_i32_0 : i32, i32
  }
  func.func @transform_6(%arg0: i32) -> (i32, i32) {
    %c0_i32 = arith.constant 0 : i32
    %c0_i32_0 = arith.constant 0 : i32
    %c0_i32_1 = arith.constant 0 : i32
    return %c0_i32, %c0_i32_0 : i32, i32
  }
  func.func @transform_7(%arg0: i32) -> (i32, i32) {
    %c0_i32 = arith.constant 0 : i32
    %c0_i32_0 = arith.constant 0 : i32
    %c0_i32_1 = arith.constant 0 : i32
    return %c0_i32, %c0_i32_0 : i32, i32
  }
  func.func @transform_8(%arg0: i32) -> (i32, i32) {
    %c0_i32 = arith.constant 0 : i32
    %c0_i32_0 = arith.constant 0 : i32
    %c0_i32_1 = arith.constant 0 : i32
    return %c0_i32, %c0_i32_0 : i32, i32
  }
  func.func @transform_9(%arg0: i32) -> (i32, i32) {
    %c0_i32 = arith.constant 0 : i32
    %c0_i32_0 = arith.constant 0 : i32
    %c0_i32_1 = arith.constant 0 : i32
    return %c0_i32, %c0_i32_0 : i32, i32
  }
  func.func @transform_10(%arg0: i32) -> (i32, i32) {
    %c0_i32 = arith.constant 0 : i32
    %c0_i32_0 = arith.constant 0 : i32
    %c0_i32_1 = arith.constant 0 : i32
    return %c0_i32, %c0_i32_0 : i32, i32
  }
  func.func @transform_11(%arg0: i32) -> (i32, i32) {
    %c0_i32 = arith.constant 0 : i32
    %c0_i32_0 = arith.constant 0 : i32
    %c0_i32_1 = arith.constant 0 : i32
    return %c0_i32, %c0_i32_0 : i32, i32
  }
  func.func @transform_12(%arg0: i32) -> (i32, i32) {
    %c0_i32 = arith.constant 0 : i32
    %c0_i32_0 = arith.constant 0 : i32
    %c0_i32_1 = arith.constant 0 : i32
    return %c0_i32, %c0_i32_0 : i32, i32
  }
  func.func @transform_13(%arg0: i32) -> (i32, i32) {
    %c0_i32 = arith.constant 0 : i32
    %c0_i32_0 = arith.constant 0 : i32
    %c0_i32_1 = arith.constant 0 : i32
    return %c0_i32, %c0_i32_0 : i32, i32
  }
  func.func @transform_14(%arg0: i32) -> (i32, i32) {
    %c0_i32 = arith.constant 0 : i32
    %c0_i32_0 = arith.constant 0 : i32
    %c0_i32_1 = arith.constant 0 : i32
    return %c0_i32, %c0_i32_0 : i32, i32
  }
  func.func @transform_15(%arg0: i32) -> (i32, i32) {
    %c0_i32 = arith.constant 0 : i32
    %c0_i32_0 = arith.constant 0 : i32
    %c0_i32_1 = arith.constant 0 : i32
    return %c0_i32, %c0_i32_0 : i32, i32
  }
  func.func @transform_16(%arg0: i32) -> (i32, i32, i32) {
    %c0_i32 = arith.constant 0 : i32
    %c0_i32_0 = arith.constant 0 : i32
    %c0_i32_1 = arith.constant 0 : i32
    return %arg0, %c0_i32, %c0_i32_0 : i32, i32, i32
  }
}

</mosaic_0001>

<bundles_post_ra>
// kernel: soundstorm_forward.1
= control target key start
LH: loop header
LB: loop body
LE: loop exit
PB: predicated region body
PF: predicated region fallthrough
CT: control target
= control target key end

     0   :  { %vm66_vm0 = vcmask 261120   ;;  %v1744_v16 = vmov 32.0   ;;  %s2640_s0 = inlined_call_operand.vmem [shape: f32[32,32], index: 0, kind: input, shape index: {}]   ;;  %s2641_s1 = inlined_call_operand.vmem [shape: f32[32,32], index: 1, kind: input, shape index: {}]   ;;  %s2642_s3 = inlined_call_operand.vmem [shape: f32[1,32], index: 3, kind: input, shape index: {}]   ;;  %s2643_s4 = inlined_call_operand.vmem [shape: f32[1,32], index: 4, kind: input, shape index: {}]   ;;  %s2644_s6 = inlined_call_operand.vmem [shape: f32[1,128], index: 6, kind: input, shape index: {}]   ;;  %s2645_s5 = inlined_call_operand.vmem [shape: bf16[32,128], index: 5, kind: input, shape index: {}]   ;;  %s2646_s8 = inlined_call_operand.vmem [shape: bf16[128,128], index: 8, kind: input, shape index: {}]   ;;  %s2647_s7 = inlined_call_operand.vmem [shape: bf16[32,128], index: 7, kind: input, shape index: {}]   ;;  %s2648_s9 = inlined_call_operand.vmem [shape: f32[1,128], index: 9, kind: input, shape index: {}]   ;;  %s2649_s12 = inlined_call_operand.vmem [shape: bf16[128,128], index: 12, kind: input, shape index: {}]   ;;  %s2650_s10 = inlined_call_operand.vmem [shape: f32[1,128], index: 10, kind: input, shape index: {}]   ;;  %s2651_s11 = inlined_call_operand.vmem [shape: f32[1,128], index: 11, kind: input, shape index: {}]   ;;  %s2652_s13 = inlined_call_operand.vmem [shape: bf16[128,256], index: 13, kind: input, shape index: {}]   ;;  %s2653_s14 = inlined_call_operand.vmem [shape: f32[1,256], index: 14, kind: input, shape index: {}]   ;;  %s2654_s15 = inlined_call_operand.vmem [shape: bf16[256,256], index: 15, kind: input, shape index: {}]   ;;  %s2655_s2 = inlined_call_operand.vmem [shape: f32[32,4], index: 2, kind: input, shape index: {}]   ;;  %s2656_s16 = inlined_call_operand.vmem [shape: f32[1,1,128], index: 16, kind: output, shape index: {}]  }
   0x1   :  { %2658 = sst [smem:[#allocation2_spill]] %s2640_s0  ;;  %v60_v1 = vld [vmem:[%s2641_s1 + $0x10] sm:$0xff]  ;;  %v58_v4 = vld [vmem:[%s2641_s1] sm:$0xff]  ;;  %v61_v7 = vld [vmem:[%s2641_s1 + $0x18] sm:$0xff]  ;;  %1686 = vrcp.f32 %v1744_v16 }
   0x2   :  { %s2659_s23 = sld [smem:[#allocation2_spill]]  ;;  %v59_v10 = vld [vmem:[%s2641_s1 + $0x8] sm:$0xff]  ;;  %v1578_v46 = vld [vmem:[%s2645_s5] sm:$0xff] }
   0x3   :  { %v1579_v43 = vld [vmem:[%s2645_s5 + $0x8] sm:$0xff] }
   0x4   :  { %212 = vmatpush.bf16.msra.mxu0 %v1579_v43  ;;  %v1589_v43 = vld [vmem:[%s2646_s8 + $0x38] sm:$0xff] }
   0x5   :  { %333 = vmatpush.bf16.msra.mxu1 %v1589_v43  ;;  %v1592_v43 = vld [vmem:[%s2649_s12 + $0x10] sm:$0xff] }
   0x7   :  { %v1687_v17 = vpop.eup %1686 }
   0x8   :  { %v56_v0 = vld [vmem:[%s2659_s23 + $0x10] sm:$0xff]  ;;  %v54_v2 = vld [vmem:[%s2659_s23] sm:$0xff]  ;;  %v57_v6 = vld [vmem:[%s2659_s23 + $0x18] sm:$0xff]  ;;  %v80_v18 = vmul.f32 32.0, %v1687_v17  ;;  %vm84_vm1 = vweird.f32 %v1687_v17  ;;  %213 = vmatpush.bf16.msra.mxu0 %v1578_v46 }
   0x9   :  { %v1844_v3 = vadd.f32 %v60_v1, %v56_v0  ;;  %v1849_v5 = vadd.f32 %v58_v4, %v54_v2  ;;  %v55_v9 = vld [vmem:[%s2659_s23 + $0x8] sm:$0xff]  ;;  %v1867_v12 = vadd.f32 %v61_v7, %v57_v6  ;;  %v1580_v46 = vld [vmem:[%s2647_s7] sm:$0xff] }
   0xa   :  { %v1869_v13 = vadd.f32 %v59_v10, %v55_v9  ;;  %v81_v19 = vsub.f32 1.0, %v80_v18 }
   0xb   :  { %v73_v8 = vsel %vm66_vm0, %v1844_v3, 0.0  ;;  %v67_v11 = vsel %vm66_vm0, %v1849_v5, 0.0  ;;  %v76_v14 = vsel %vm66_vm0, %v1867_v12, 0.0 }
   0xc   :  { %74 = vadd.xlane.f32.xlu1 %v73_v8  ;;  %68 = vadd.xlane.f32.xlu0 %v67_v11  ;;  %v70_v15 = vsel %vm66_vm0, %v1869_v13, 0.0  ;;  %v82_v20 = vmul.f32 %v1687_v17, %v81_v19 }
   0xe   :  { %v83_v21 = vadd.f32 %v1687_v17, %v82_v20 }
  0x10   :  { %v85_v22 = vsel %vm84_vm1, %v1687_v17, %v83_v21  ;;  %v1680_v17 = vld [vmem:[%s2642_s3] ss:$0 sm:$0xff] }
  0x14   :  { %77 = vadd.xlane.f32.xlu1 %v76_v14  ;;  %71 = vadd.xlane.f32.xlu0 %v70_v15 }
  0x7f   :  { %v75_v23 = vpop.xlane.xlu1 %74  ;;  %v69_v25 = vpop.xlane.xlu0 %68 }
  0x80   :  { %v88_v24 = vmul.f32 %v85_v22, %v75_v23  ;;  %v86_v26 = vmul.f32 %v85_v22, %v69_v25 }
  0x82   :  { %v1876_v27 = vsub.f32 %v1844_v3, %v88_v24  ;;  %v1879_v28 = vsub.f32 %v1849_v5, %v86_v26  ;;  %v1681_v24 = vld [vmem:[%s2643_s4] ss:$0 sm:$0xff] }
  0x84   :  { %v96_v29 = vmul.f32 %v1876_v27, %v1876_v27  ;;  %v94_v30 = vmul.f32 %v1879_v28, %v1879_v28 }
  0x86   :  { %v104_v31 = vsel %vm66_vm0, %v96_v29, 0.0  ;;  %v98_v33 = vsel %vm66_vm0, %v94_v30, 0.0 }
  0x87   :  { %v78_v32 = vpop.xlane.xlu1 %77  ;;  %105 = vadd.xlane.f32.xlu0 %v104_v31  ;;  %99 = vadd.xlane.f32.xlu2 %v98_v33  ;;  %v72_v35 = vpop.xlane.xlu0 %71 }
  0x88   :  { %v89_v34 = vmul.f32 %v85_v22, %v78_v32  ;;  %v87_v36 = vmul.f32 %v85_v22, %v72_v35 }
  0x8a   :  { %v1888_v37 = vsub.f32 %v1867_v12, %v89_v34  ;;  %v1891_v38 = vsub.f32 %v1869_v13, %v87_v36 }
  0x8c   :  { %v97_v39 = vmul.f32 %v1888_v37, %v1888_v37  ;;  %v95_v40 = vmul.f32 %v1891_v38, %v1891_v38 }
  0x8e   :  { %v107_v41 = vsel %vm66_vm0, %v97_v39, 0.0  ;;  %v101_v42 = vsel %vm66_vm0, %v95_v40, 0.0 }
  0x8f   :  { %108 = vadd.xlane.f32.xlu1 %v107_v41  ;;  %102 = vadd.xlane.f32.xlu2 %v101_v42 }
  0xfa   :  { %v100_v44 = vpop.xlane.xlu2 %99  ;;  %v106_v45 = vpop.xlane.xlu0 %105 }
  0xfb   :  { %v110_v47 = vmul.f32 %v100_v44, %v85_v22  ;;  %v112_v49 = vmul.f32 %v106_v45, %v85_v22  ;;  %v1588_v44 = vld [vmem:[%s2646_s8 + $0x30] sm:$0xff]  ;;  %v1586_v45 = vld [vmem:[%s2646_s8 + $0x20] sm:$0xff] }
  0xfc   :  { %334 = vmatpush.bf16.msra.mxu1 %v1588_v44  ;;  %v1591_v44 = vld [vmem:[%s2649_s12 + $0x8] sm:$0xff] }
  0xfd   :  { %v114_v48 = vadd.f32 1e-05, %v110_v47  ;;  %v116_v50 = vadd.f32 1e-05, %v112_v49  ;;  %v1585_v47 = vld [vmem:[%s2646_s8 + $0x18] sm:$0xff]  ;;  %v1584_v49 = vld [vmem:[%s2646_s8 + $0x10] sm:$0xff] }
  0xff   :  { %1688 = vrsqrt.f32 %v114_v48  ;;  %vm124_vm3 = vweird.f32 %v114_v48  ;;  %vm144_vm10 = vweird.f32 %v116_v50 }
 0x100   :  { %1690 = vrsqrt.f32 %v116_v50 }
 0x102   :  { %v109_v51 = vpop.xlane.xlu1 %108  ;;  %v103_v53 = vpop.xlane.xlu2 %102 }
 0x103   :  { %v113_v52 = vmul.f32 %v109_v51, %v85_v22  ;;  %v111_v54 = vmul.f32 %v103_v53, %v85_v22  ;;  %v1682_v51 = vld [vmem:[%s2644_s6] ss:$0 sm:$0xff] }
 0x105   :  { %v117_v55 = vadd.f32 1e-05, %v113_v52  ;;  %v1689_v56 = vpop.eup %1688  ;;  %v115_v57 = vadd.f32 1e-05, %v111_v54  ;;  %v262_v54 = vpack.c.bf16 %v1867_v12, %v1844_v3  ;;  %v1597_v3 = vld [vmem:[%s2649_s12 + $0x38] sm:$0xff] }
 0x106   :  { %v119_v58 = vmul.f32 %v1689_v56, %v114_v48  ;;  %v1691_v61 = vpop.eup %1690  ;;  %vm125_vm2 = vweird.f32 %v1689_v56  ;;  %v261_v48 = vpack.c.bf16 %v1869_v13, %v1849_v5  ;;  %v1582_v5 = vld [vmem:[%s2646_s8] sm:$0xff]  ;;  %463 = vmatpush.bf16.msra.mxu3 %v1597_v3  ;;  %492 = vmatpush.bf16.msrb.mxu0 %v1597_v3 }
 0x107   :  { %1692 = vrsqrt.f32 %v117_v55  ;;  %v139_v4 = vmul.f32 %v1691_v61, %v116_v50  ;;  %vm126_vm4 = vmor %vm124_vm3, %vm125_vm2  ;;  %vm134_vm6 = vweird.f32 %v115_v57  ;;  %vm154_vm8 = vweird.f32 %v117_v55  ;;  %v1583_v50 = vld [vmem:[%s2646_s8 + $0x8] sm:$0xff] }
 0x108   :  { %1694 = vrsqrt.f32 %v115_v57  ;;  %v120_v59 = vmul.f32 %v1689_v56, %v119_v58  ;;  %vm145_vm11 = vweird.f32 %v1691_v61 }
 0x109   :  { %v140_v10 = vmul.f32 %v1691_v61, %v139_v4  ;;  %vm146_vm13 = vmor %vm144_vm10, %vm145_vm11  ;;  %vm733_vm10 = vcmask 1048064   ;;  %vm720_vm11 = vcmask 523264  }
 0x10a   :  { %v121_v60 = vmul.f32 0.5, %v120_v59 }
 0x10b   :  { %v141_v18 = vmul.f32 0.5, %v140_v10 }
 0x10c   :  { %v122_v63 = vsub.f32 1.5, %v121_v60 }
 0x10d   :  { %v1693_v62 = vpop.eup %1692  ;;  %v142_v25 = vsub.f32 1.5, %v141_v18 }
 0x10e   :  { %v1695_v0 = vpop.eup %1694  ;;  %v149_v1 = vmul.f32 %v1693_v62, %v117_v55  ;;  %v123_v2 = vmul.f32 %v1689_v56, %v122_v63  ;;  %vm155_vm9 = vweird.f32 %v1693_v62 }
 0x10f   :  { %v129_v6 = vmul.f32 %v1695_v0, %v115_v57  ;;  %vm135_vm5 = vweird.f32 %v1695_v0  ;;  %vm156_vm12 = vmor %vm154_vm8, %vm155_vm9  ;;  %v143_v31 = vmul.f32 %v1691_v61, %v142_v25 }
 0x110   :  { %v150_v7 = vmul.f32 %v1693_v62, %v149_v1  ;;  %v127_v9 = vsel %vm126_vm4, %v1689_v56, %v123_v2  ;;  %vm136_vm7 = vmor %vm134_vm6, %vm135_vm5 }
 0x111   :  { %v130_v8 = vmul.f32 %v1695_v0, %v129_v6  ;;  %v158_v16 = vmul.f32 %v127_v9, %v1879_v28  ;;  %v147_v34 = vsel %vm146_vm13, %v1691_v61, %v143_v31 }
 0x112   :  { %v151_v14 = vmul.f32 0.5, %v150_v7  ;;  %v160_v36 = vmul.f32 %v147_v34, %v1876_v27  ;;  %v1587_v27 = vld [vmem:[%s2646_s8 + $0x28] sm:$0xff] }
 0x113   :  { %v131_v11 = vmul.f32 0.5, %v130_v8  ;;  %v166_v23 = vmul.f32 %v1680_v17, %v158_v16  ;;  %335 = vmatpush.bf16.msra.mxu1 %v1587_v27  ;;  %v1596_v8 = vld [vmem:[%s2649_s12 + $0x30] sm:$0xff]  ;;  %v1590_v27 = vld [vmem:[%s2649_s12] sm:$0xff] }
 0x114   :  { %v152_v20 = vsub.f32 1.5, %v151_v14  ;;  %v168_v39 = vmul.f32 %v1680_v17, %v160_v36  ;;  %464 = vmatpush.bf16.msra.mxu3 %v1596_v8  ;;  %493 = vmatpush.bf16.msrb.mxu0 %v1596_v8 }
 0x115   :  { %v132_v15 = vsub.f32 1.5, %v131_v11  ;;  %v174_v29 = vadd.f32 %v1681_v24, %v166_v23 }
 0x116   :  { %v153_v28 = vmul.f32 %v1693_v62, %v152_v20  ;;  %v176_v41 = vadd.f32 %v1681_v24, %v168_v39 }
 0x117   :  { %v133_v19 = vmul.f32 %v1695_v0, %v132_v15  ;;  %336 = vmatpush.bf16.msra.mxu1 %v1586_v45 }
 0x118   :  { %v157_v33 = vsel %vm156_vm12, %v1693_v62, %v153_v28 }
 0x119   :  { %v137_v21 = vsel %vm136_vm7, %v1695_v0, %v133_v19  ;;  %v161_v35 = vmul.f32 %v157_v33, %v1888_v37  ;;  %v1581_v37 = vld [vmem:[%s2647_s7 + $0x8] sm:$0xff] }
 0x11a   :  { %v159_v22 = vmul.f32 %v137_v21, %v1891_v38  ;;  %376 = vmatpush.bf16.msra.mxu2 %v1581_v37 }
 0x11b   :  { %v169_v38 = vmul.f32 %v1680_v17, %v161_v35  ;;  %337 = vmatpush.bf16.msra.mxu1 %v1585_v47 }
 0x11c   :  { %v167_v26 = vmul.f32 %v1680_v17, %v159_v22 }
 0x11d   :  { %v177_v40 = vadd.f32 %v1681_v24, %v169_v38 }
 0x11e   :  { %v175_v30 = vadd.f32 %v1681_v24, %v167_v26  ;;  %377 = vmatpush.bf16.msra.mxu2 %v1580_v46 }
 0x11f   :  { %v179_v42 = vpack.c.bf16 %v177_v40, %v176_v41  ;;  %338 = vmatpush.bf16.msra.mxu1 %v1584_v49  ;;  %v1595_v40 = vld [vmem:[%s2649_s12 + $0x28] sm:$0xff]  ;;  %v1594_v41 = vld [vmem:[%s2649_s12 + $0x20] sm:$0xff] }
 0x120   :  { %v178_v32 = vpack.c.bf16 %v175_v30, %v174_v29  ;;  %465 = vmatpush.bf16.msra.mxu3 %v1595_v40  ;;  %494 = vmatpush.bf16.msrb.mxu0 %v1595_v40  ;;  %v1410_v40 = vld [vmem:[%s2652_s13 + $0x38] sm:$0xf0] }
 0x121   :  { %1348 = vmatmul.msk.bf16.vlgmr.msra.gmra.mxu2 %vm66_vm0, %v261_v48  ;;  %v1683_v48 = vld [vmem:[%s2648_s9] ss:$0 sm:$0xff] }
 0x122   :  { %1306 = vmatmul.msk.bf16.vlgmr.msra.gmra.mxu0 %vm66_vm0, %v178_v32 }
 0x123   :  { %339 = vmatpush.bf16.msra.mxu1 %v1583_v50 }
 0x124   :  { %466 = vmatpush.bf16.msra.mxu3 %v1594_v41  ;;  %495 = vmatpush.bf16.msrb.mxu0 %v1594_v41  ;;  %v1408_v41 = vld [vmem:[%s2652_s13 + $0x30] sm:$0xf] }
 0x127   :  { %340 = vmatpush.bf16.msra.mxu1 %v1582_v5 }
 0x131   :  { %1349 = vmatmul.msk.bf16.gmra.mxu2 %vm66_vm0, %v262_v54 }
 0x132   :  { %1307 = vmatmul.msk.bf16.gmra.mxu0 %vm66_vm0, %v179_v42  ;;  %v1593_v42 = vld [vmem:[%s2649_s12 + $0x18] sm:$0xff] }
 0x133   :  { %467 = vmatpush.bf16.msra.mxu3 %v1593_v42  ;;  %496 = vmatpush.bf16.msrb.mxu0 %v1593_v42 }
 0x137   :  { %468 = vmatpush.bf16.msra.mxu3 %v1592_v43  ;;  %497 = vmatpush.bf16.msrb.mxu0 %v1592_v43  ;;  %v1605_v43 = vld [vmem:[%s2652_s13 + $0x34] sm:$0xf0] }
 0x13b   :  { %469 = vmatpush.bf16.msra.mxu3 %v1591_v44  ;;  %498 = vmatpush.bf16.msrb.mxu0 %v1591_v44  ;;  %v1409_v44 = vor.u32 %v1605_v43, %v1408_v41 }
 0x13f   :  { %470 = vmatpush.bf16.msra.mxu3 %v1590_v27  ;;  %499 = vmatpush.bf16.msrb.mxu0 %v1590_v27  ;;  %v1602_v27 = vld [vmem:[%s2652_s13 + $0x24] sm:$0xf] }
 0x19f   :  { %v215_v13 = vpop.f32.mrf.mxu0 }
 0x1a0   :  { %v216_v52 = vadd.f32 %v1682_v51, %v215_v13 }
 0x1a2   :  { %v225_v53 = vmul.f32 %v216_v52, %v216_v52 }
 0x1a4   :  { %v229_v55 = vmul.f32 %v225_v53, %v216_v52  ;;  %v379_v37 = vpop.f32.mrf.mxu2 }
 0x1a6   :  { %v233_v56 = vmul.f32 0.044715, %v229_v55 }
 0x1a7   :  { %v217_v57 = vpop.f32.mrf.mxu0 }
 0x1a8   :  { %v237_v58 = vadd.f32 %v233_v56, %v216_v52  ;;  %v218_v59 = vadd.f32 %v1682_v51, %v217_v57 }
 0x1aa   :  { %v226_v60 = vmul.f32 %v218_v59, %v218_v59  ;;  %v241_v61 = vmul.f32 0.7978846, %v237_v58 }
 0x1ac   :  { %v230_v62 = vmul.f32 %v226_v60, %v218_v59  ;;  %1696 = vtanh.f32 %v241_v61  ;;  %v381_v46 = vpop.f32.mrf.mxu2 }
 0x1ae   :  { %v234_v63 = vmul.f32 0.044715, %v230_v62 }
 0x1af   :  { %v220_v0 = vpop.f32.mrf.mxu0 }
 0x1b0   :  { %v238_v1 = vadd.f32 %v234_v63, %v218_v59  ;;  %v221_v2 = vadd.f32 %v1682_v51, %v220_v0 }
 0x1b2   :  { %v227_v4 = vmul.f32 %v221_v2, %v221_v2  ;;  %v242_v6 = vmul.f32 0.7978846, %v238_v1  ;;  %v1697_v12 = vpop.eup %1696 }
 0x1b3   :  { %v249_v11 = vadd.f32 1.0, %v1697_v12 }
 0x1b4   :  { %v231_v7 = vmul.f32 %v227_v4, %v221_v2  ;;  %1698 = vtanh.f32 %v242_v6 }
 0x1b5   :  { %v253_v20 = vmul.f32 0.5, %v249_v11  ;;  %v1612_v11 = vld [vmem:[%s2652_s13 + $0x74] sm:$0xf] }
 0x1b6   :  { %v235_v9 = vmul.f32 0.044715, %v231_v7 }
 0x1b7   :  { %v222_v10 = vpop.f32.mrf.mxu0  ;;  %v257_v24 = vmul.f32 %v253_v20, %v216_v52  ;;  %v384_v52 = vpop.f32.mrf.mxu2  ;;  %v1434_v20 = vld [vmem:[%s2652_s13 + $0x68] sm:$0xf0] }
 0x1b8   :  { %v239_v14 = vadd.f32 %v235_v9, %v221_v2  ;;  %v223_v15 = vadd.f32 %v1682_v51, %v222_v10 }
 0x1ba   :  { %v1699_v16 = vpop.eup %1698  ;;  %v228_v17 = vmul.f32 %v223_v15, %v223_v15  ;;  %v243_v18 = vmul.f32 0.7978846, %v239_v14  ;;  %v1442_v14 = vld [vmem:[%s2652_s13 + $0x78] sm:$0xf0] }
 0x1bb   :  { %v250_v19 = vadd.f32 1.0, %v1699_v16  ;;  %v1445_v16 = vor.u32 %v1612_v11, %v1442_v14 }
 0x1bc   :  { %v232_v21 = vmul.f32 %v228_v17, %v223_v15  ;;  %1700 = vtanh.f32 %v243_v18  ;;  %v1613_v17 = vld [vmem:[%s2652_s13 + $0x74] sm:$0xf0] }
 0x1bd   :  { %v254_v22 = vmul.f32 0.5, %v250_v19  ;;  %694 = vmatpush.bf16.msrb.mxu1 %v1445_v16  ;;  %v1610_v19 = vld [vmem:[%s2652_s13 + $0x64] sm:$0xf] }
 0x1be   :  { %v236_v23 = vmul.f32 0.044715, %v232_v21  ;;  %v1432_v21 = vld [vmem:[%s2652_s13 + $0x60] sm:$0xf] }
 0x1bf   :  { %v258_v25 = vmul.f32 %v254_v22, %v218_v59  ;;  %v386_v55 = vpop.f32.mrf.mxu2  ;;  %v1437_v22 = vor.u32 %v1610_v19, %v1434_v20 }
 0x1c0   :  { %v240_v26 = vadd.f32 %v236_v23, %v223_v15  ;;  %v1611_v23 = vld [vmem:[%s2652_s13 + $0x64] sm:$0xf0] }
 0x1c1   :  { %v267_v28 = vpack.c.bf16 %v258_v25, %v257_v24  ;;  %v1433_v24 = vor.u32 %v1611_v23, %v1432_v21  ;;  %695 = vmatpush.bf16.msrb.mxu1 %v1437_v22  ;;  %v1608_v25 = vld [vmem:[%s2652_s13 + $0x54] sm:$0xf]  ;;  %v1684_v23 = vld [vmem:[%s2650_s10] ss:$0 sm:$0xff] }
 0x1c2   :  { %v244_v29 = vmul.f32 0.7978846, %v240_v26  ;;  %v1701_v30 = vpop.eup %1700  ;;  %v1426_v26 = vld [vmem:[%s2652_s13 + $0x58] sm:$0xf0] }
 0x1c3   :  { %341 = vmatmul.bf16.vlgmr.msra.gmra.mxu1 %v267_v28  ;;  %v251_v31 = vadd.f32 1.0, %v1701_v30  ;;  %v1424_v28 = vld [vmem:[%s2652_s13 + $0x50] sm:$0xf]  ;;  %v1609_v30 = vld [vmem:[%s2652_s13 + $0x54] sm:$0xf0] }
 0x1c4   :  { %1702 = vtanh.f32 %v244_v29  ;;  %v1429_v29 = vor.u32 %v1608_v25, %v1426_v26 }
 0x1c5   :  { %v255_v34 = vmul.f32 0.5, %v251_v31  ;;  %v1425_v31 = vor.u32 %v1609_v30, %v1424_v28 }
 0x1c6   :  { %696 = vmatpush.bf16.msrb.mxu1 %v1429_v29 }
 0x1c7   :  { %v259_v36 = vmul.f32 %v255_v34, %v221_v2  ;;  %v1416_v34 = vld [vmem:[%s2652_s13 + $0x40] sm:$0xf] }
 0x1ca   :  { %v1703_v32 = vpop.eup %1702 }
 0x1cb   :  { %v252_v33 = vadd.f32 1.0, %v1703_v32  ;;  %v1606_v32 = vld [vmem:[%s2652_s13 + $0x44] sm:$0xf] }
 0x1cd   :  { %v256_v35 = vmul.f32 0.5, %v252_v33  ;;  %v1418_v33 = vld [vmem:[%s2652_s13 + $0x48] sm:$0xf0] }
 0x1cf   :  { %v260_v38 = vmul.f32 %v256_v35, %v223_v15  ;;  %v1440_v15 = vld [vmem:[%s2652_s13 + $0x70] sm:$0xf]  ;;  %v1421_v35 = vor.u32 %v1606_v32, %v1418_v33 }
 0x1d0   :  { %v1441_v18 = vor.u32 %v1613_v17, %v1440_v15 }
 0x1d1   :  { %v268_v39 = vpack.c.bf16 %v260_v38, %v259_v36  ;;  %v1607_v36 = vld [vmem:[%s2652_s13 + $0x44] sm:$0xf0]  ;;  %697 = vmatpush.bf16.msrb.mxu1 %v1421_v35 }
 0x1d2   :  { %675 = vmatpush.bf16.msrb.mxu2 %v1441_v18  ;;  %v1417_v38 = vor.u32 %v1607_v36, %v1416_v34 }
 0x1d3   :  { %346 = vmatmul.bf16.gmra.mxu1 %v268_v39  ;;  %v1604_v39 = vld [vmem:[%s2652_s13 + $0x34] sm:$0xf] }
 0x1d4   :  { %v1413_v42 = vor.u32 %v1604_v39, %v1410_v40 }
 0x1d6   :  { %676 = vmatpush.bf16.msrb.mxu2 %v1433_v24  ;;  %698 = vmatpush.bf16.msrb.mxu1 %v1413_v42 }
 0x1da   :  { %677 = vmatpush.bf16.msrb.mxu2 %v1425_v31  ;;  %v1685_v31 = vld [vmem:[%s2651_s11] ss:$0 sm:$0xff] }
 0x1de   :  { %678 = vmatpush.bf16.msrb.mxu2 %v1417_v38 }
 0x1e2   :  { %679 = vmatpush.bf16.msrb.mxu2 %v1409_v44 }
 0x240   :  { %v342_v45 = vpop.f32.mrf.mxu1 }
 0x241   :  { %v380_v47 = vadd.f32 %v379_v37, %v342_v45  ;;  %v1402_v37 = vld [vmem:[%s2652_s13 + $0x28] sm:$0xf0]  ;;  %v1400_v45 = vld [vmem:[%s2652_s13 + $0x20] sm:$0xf] }
 0x243   :  { %v393_v51 = vadd.f32 %v1683_v48, %v380_v47  ;;  %v1603_v47 = vld [vmem:[%s2652_s13 + $0x24] sm:$0xf0] }
 0x248   :  { %v344_v49 = vpop.f32.mrf.mxu1 }
 0x249   :  { %v382_v50 = vadd.f32 %v381_v46, %v344_v49  ;;  %v1405_v46 = vor.u32 %v1602_v27, %v1402_v37  ;;  %v1600_v49 = vld [vmem:[%s2652_s13 + $0x14] sm:$0xf] }
 0x24b   :  { %v394_v5 = vadd.f32 %v1683_v48, %v382_v50  ;;  %699 = vmatpush.bf16.msrb.mxu1 %v1405_v46  ;;  %v1394_v50 = vld [vmem:[%s2652_s13 + $0x18] sm:$0xf0] }
 0x24d   :  { %v397_v13 = vpack.c.bf16 %v394_v5, %v393_v51 }
 0x24f   :  { %471 = vmatmul.bf16.vlgmr.msra.gmra.mxu3 %v397_v13  ;;  %v1601_v13 = vld [vmem:[%s2652_s13 + $0x14] sm:$0xf0] }
 0x250   :  { %v347_v53 = vpop.f32.mrf.mxu1 }
 0x251   :  { %v385_v54 = vadd.f32 %v384_v52, %v347_v53  ;;  %v1598_v53 = vld [vmem:[%s2652_s13 + $0x4] sm:$0xf] }
 0x253   :  { %v395_v58 = vadd.f32 %v1683_v48, %v385_v54  ;;  %v1386_v54 = vld [vmem:[%s2652_s13 + $0x8] sm:$0xf0] }
 0x258   :  { %v349_v56 = vpop.f32.mrf.mxu1 }
 0x259   :  { %v387_v57 = vadd.f32 %v386_v55, %v349_v56  ;;  %v1384_v55 = vld [vmem:[%s2652_s13] sm:$0xf] }
 0x25b   :  { %v396_v59 = vadd.f32 %v1683_v48, %v387_v57  ;;  %v1401_v48 = vor.u32 %v1603_v47, %v1400_v45  ;;  %v1389_v57 = vor.u32 %v1598_v53, %v1386_v54 }
 0x25d   :  { %v398_v60 = vpack.c.bf16 %v396_v59, %v395_v58  ;;  %680 = vmatpush.bf16.msrb.mxu2 %v1401_v48 }
 0x25f   :  { %476 = vmatmul.bf16.gmra.mxu3 %v398_v60 }
 0x2d2   :  { %v472_v61 = vpop.f32.mrf.mxu3 }
 0x2d3   :  { %v1983_v62 = vsub.f32 %v393_v51, %v472_v61  ;;  %v1392_v51 = vld [vmem:[%s2652_s13 + $0x10] sm:$0xf] }
 0x2d4   :  { %v1393_v52 = vor.u32 %v1601_v13, %v1392_v51  ;;  %v589_v51 = vld [vmem:[%s2653_s14] sm:$0x3] }
 0x2d5   :  { %v486_v1 = vmul.f32 %v1983_v62, %v1983_v62  ;;  %v591_v53 = vperm.slane %v589_v51, 0 }
 0x2d6   :  { %681 = vmatpush.bf16.msrb.mxu2 %v1393_v52 }
 0x2da   :  { %v474_v63 = vpop.f32.mrf.mxu3 }
 0x2db   :  { %v1985_v0 = vsub.f32 %v394_v5, %v474_v63  ;;  %v1397_v5 = vor.u32 %v1600_v49, %v1394_v50 }
 0x2dd   :  { %v487_v2 = vmul.f32 %v1985_v0, %v1985_v0  ;;  %700 = vmatpush.bf16.msrb.mxu1 %v1397_v5  ;;  %v592_v5 = vperm.slane %v589_v51, 1  ;;  %v1624_v51 = vld [vmem:[%s2654_s15 + $0x54] sm:$0xf] }
 0x2df   :  { %v490_v4 = vpack.c.bf16 %v487_v2, %v486_v1 }
 0x2e1   :  { %500 = vmatmul.bf16.vlgmr.msrb.gmra.mxu0 %v490_v4  ;;  %701 = vmatpush.bf16.msrb.mxu1 %v1389_v57 }
 0x2e2   :  { %v477_v6 = vpop.f32.mrf.mxu3 }
 0x2e3   :  { %v1991_v3 = vsub.f32 %v395_v58, %v477_v6  ;;  %v1599_v58 = vld [vmem:[%s2652_s13 + $0x4] sm:$0xf0] }
 0x2e4   :  { %v1385_v60 = vor.u32 %v1599_v58, %v1384_v55 }
 0x2e5   :  { %v488_v8 = vmul.f32 %v1991_v3, %v1991_v3 }
 0x2e6   :  { %682 = vmatpush.bf16.msrb.mxu2 %v1385_v60 }
 0x2ea   :  { %v479_v12 = vpop.f32.mrf.mxu3 }
 0x2eb   :  { %v1993_v7 = vsub.f32 %v396_v59, %v479_v12 }
 0x2ed   :  { %v489_v9 = vmul.f32 %v1993_v7, %v1993_v7 }
 0x2ef   :  { %v491_v10 = vpack.c.bf16 %v489_v9, %v488_v8 }
 0x2f1   :  { %505 = vmatmul.bf16.gmra.mxu0 %v491_v10 }
 0x35e   :  { %v501_v56 = vpop.f32.mrf.mxu0 }
 0x35f   :  { %v502_v59 = vadd.f32 1e-05, %v501_v56 }
 0x361   :  { %1704 = vrsqrt.f32 %v502_v59  ;;  %vm517_vm15 = vweird.f32 %v502_v59 }
 0x366   :  { %v503_v61 = vpop.f32.mrf.mxu0 }
 0x367   :  { %v1705_v63 = vpop.eup %1704  ;;  %v504_v1 = vadd.f32 1e-05, %v503_v61 }
 0x368   :  { %v512_v2 = vmul.f32 %v1705_v63, %v502_v59  ;;  %vm518_vm14 = vweird.f32 %v1705_v63 }
 0x369   :  { %1706 = vrsqrt.f32 %v504_v1  ;;  %vm519_vm0 = vmor %vm517_vm15, %vm518_vm14  ;;  %vm527_vm2 = vweird.f32 %v504_v1 }
 0x36a   :  { %v513_v4 = vmul.f32 %v1705_v63, %v512_v2 }
 0x36c   :  { %v514_v6 = vmul.f32 0.5, %v513_v4 }
 0x36e   :  { %v515_v12 = vsub.f32 1.5, %v514_v6  ;;  %v506_v8 = vpop.f32.mrf.mxu0 }
 0x36f   :  { %v1707_v9 = vpop.eup %1706  ;;  %v507_v10 = vadd.f32 1e-05, %v506_v8 }
 0x370   :  { %v516_v11 = vmul.f32 %v1705_v63, %v515_v12  ;;  %v522_v14 = vmul.f32 %v1707_v9, %v504_v1  ;;  %vm528_vm1 = vweird.f32 %v1707_v9 }
 0x371   :  { %1708 = vrsqrt.f32 %v507_v10  ;;  %vm529_vm3 = vmor %vm527_vm2, %vm528_vm1  ;;  %vm537_vm5 = vweird.f32 %v507_v10 }
 0x372   :  { %v523_v15 = vmul.f32 %v1707_v9, %v522_v14  ;;  %v520_v16 = vsel %vm519_vm0, %v1705_v63, %v516_v11 }
 0x373   :  { %v551_v21 = vmul.f32 %v520_v16, %v1983_v62 }
 0x374   :  { %v524_v17 = vmul.f32 0.5, %v523_v15 }
 0x375   :  { %v559_v30 = vmul.f32 %v1684_v23, %v551_v21 }
 0x376   :  { %v525_v18 = vsub.f32 1.5, %v524_v17  ;;  %v508_v19 = vpop.f32.mrf.mxu0 }
 0x377   :  { %v1709_v20 = vpop.eup %1708  ;;  %v509_v22 = vadd.f32 1e-05, %v508_v19  ;;  %v567_v35 = vadd.f32 %v1685_v31, %v559_v30  ;;  %v1628_v30 = vld [vmem:[%s2654_s15 + $0x74] sm:$0xf] }
 0x378   :  { %v526_v24 = vmul.f32 %v1707_v9, %v525_v18  ;;  %v532_v25 = vmul.f32 %v1709_v20, %v507_v10  ;;  %vm538_vm4 = vweird.f32 %v1709_v20 }
 0x379   :  { %1710 = vrsqrt.f32 %v509_v22  ;;  %vm539_vm6 = vmor %vm537_vm5, %vm538_vm4  ;;  %vm547_vm8 = vweird.f32 %v509_v22  ;;  %vm1270_vm4 = vcmask 31744  }
 0x37a   :  { %v530_v26 = vsel %vm529_vm3, %v1707_v9, %v526_v24  ;;  %v533_v28 = vmul.f32 %v1709_v20, %v532_v25  ;;  %v1504_v24 = vld [vmem:[%s2654_s15 + $0x70] sm:$0xf]  ;;  %v1629_v25 = vld [vmem:[%s2654_s15 + $0x74] sm:$0xf0] }
 0x37b   :  { %v552_v29 = vmul.f32 %v530_v26, %v1985_v0  ;;  %v1568_v26 = vld [vmem:[%s2654_s15 + $0xf0] sm:$0xf] }
 0x37c   :  { %v534_v62 = vmul.f32 0.5, %v533_v28  ;;  %v1505_v28 = vor.u32 %v1629_v25, %v1504_v24  ;;  %v1636_v24 = vld [vmem:[%s2654_s15 + $0xb4] sm:$0xf] }
 0x37d   :  { %v560_v32 = vmul.f32 %v1684_v23, %v552_v29  ;;  %v1645_v29 = vld [vmem:[%s2654_s15 + $0xf4] sm:$0xf0] }
 0x37e   :  { %v535_v33 = vsub.f32 1.5, %v534_v62  ;;  %v1569_v62 = vor.u32 %v1645_v29, %v1568_v26  ;;  %1020 = vmatpush.bf16.msrb.mxu3 %v1505_v28  ;;  %v1538_v26 = vld [vmem:[%s2654_s15 + $0xb8] sm:$0xf0]  ;;  %v713_v29 = vlaneseq }
 0x37f   :  { %v1711_v34 = vpop.eup %1710  ;;  %v568_v36 = vadd.f32 %v1685_v31, %v560_v32  ;;  %v2288_v28 = vor.u32 %v1636_v24, %v1538_v26  ;;  %v2404_v26 = vld [vmem:[%s2655_s2] sm:$0xff] }
 0x380   :  { %v536_v38 = vmul.f32 %v1709_v20, %v535_v33  ;;  %v542_v39 = vmul.f32 %v1711_v34, %v509_v22  ;;  %vm548_vm7 = vweird.f32 %v1711_v34  ;;  %v1644_v33 = vld [vmem:[%s2654_s15 + $0xf4] sm:$0xf]  ;;  %1039 = vmatpush.bf16.msra.mxu0 %v1569_v62  ;;  %v1528_v62 = vld [vmem:[%s2654_s15 + $0xa0] sm:$0xf]  ;;  %vm1258_vm2 = vcmp.ge.f32.partialorder %v2404_v26, 0.0 }
 0x381   :  { %v571_v40 = vpack.c.bf16 %v568_v36, %v567_v35  ;;  %vm549_vm9 = vmor %vm547_vm8, %vm548_vm7  ;;  %v1496_v36 = vld [vmem:[%s2654_s15 + $0x60] sm:$0xf] }
 0x382   :  { %v543_v41 = vmul.f32 %v1711_v34, %v542_v39  ;;  %v540_v0 = vsel %vm539_vm6, %v1709_v20, %v536_v38  ;;  %v1627_v38 = vld [vmem:[%s2654_s15 + $0x64] sm:$0xf0]  ;;  %v1560_v39 = vld [vmem:[%s2654_s15 + $0xe0] sm:$0xf] }
 0x383   :  { %683 = vmatmul.bf16.vlgmr.msrb.gmra.mxu2 %v571_v40  ;;  %702 = vmatmul.bf16.vlgmr.msrb.gmra.mxu1 %v571_v40  ;;  %v553_v44 = vmul.f32 %v540_v0, %v1991_v3  ;;  %v1497_v40 = vor.u32 %v1627_v38, %v1496_v36  ;;  %v1626_v0 = vld [vmem:[%s2654_s15 + $0x64] sm:$0xf]  ;;  %v1466_v36 = vld [vmem:[%s2654_s15 + $0x28] sm:$0xf0] }
 0x384   :  { %v544_v42 = vmul.f32 0.5, %v543_v41  ;;  %v1643_v41 = vld [vmem:[%s2654_s15 + $0xe4] sm:$0xf0] }
 0x385   :  { %v561_v46 = vmul.f32 %v1684_v23, %v553_v44  ;;  %1021 = vmatpush.bf16.msrb.mxu3 %v1497_v40  ;;  %v1634_v40 = vld [vmem:[%s2654_s15 + $0xa4] sm:$0xf] }
 0x386   :  { %v545_v43 = vsub.f32 1.5, %v544_v42  ;;  %v1498_v42 = vld [vmem:[%s2654_s15 + $0x68] sm:$0xf0] }
 0x387   :  { %v569_v48 = vadd.f32 %v1685_v31, %v561_v46  ;;  %v1501_v44 = vor.u32 %v1626_v0, %v1498_v42  ;;  %v1488_v46 = vld [vmem:[%s2654_s15 + $0x50] sm:$0xf]  ;;  %v2315_v0 = vand.u32 127, %v713_v29 }
 0x388   :  { %v546_v27 = vmul.f32 %v1711_v34, %v545_v43  ;;  %v1561_v43 = vor.u32 %v1643_v41, %v1560_v39  ;;  %v1530_v41 = vld [vmem:[%s2654_s15 + $0xa8] sm:$0xf0] }
 0x389   :  { %v2317_v42 = vor.u32 %v1634_v40, %v1530_v41 }
 0x38a   :  { %v550_v37 = vsel %vm549_vm9, %v1711_v34, %v546_v27  ;;  %v1570_v34 = vld [vmem:[%s2654_s15 + $0xf8] sm:$0xf0]  ;;  %v1642_v27 = vld [vmem:[%s2654_s15 + $0xe4] sm:$0xf]  ;;  %1040 = vmatpush.bf16.msra.mxu0 %v1561_v43  ;;  %v1456_v43 = vld [vmem:[%s2654_s15 + $0x10] sm:$0xf] }
 0x38b   :  { %v554_v45 = vmul.f32 %v550_v37, %v1993_v7  ;;  %v2180_v35 = vor.u32 %v1644_v33, %v1570_v34  ;;  %v1562_v37 = vld [vmem:[%s2654_s15 + $0xe8] sm:$0xf0]  ;;  %v1635_v33 = vld [vmem:[%s2654_s15 + $0xa4] sm:$0xf0]  ;;  %v1618_v34 = vld [vmem:[%s2654_s15 + $0x24] sm:$0xf] }
 0x38c   :  { %v1529_v38 = vor.u32 %v1635_v33, %v1528_v62  ;;  %v1469_v39 = vor.u32 %v1618_v34, %v1466_v36  ;;  %v2429_v36 = vld [vmem:[%s2655_s2 + $0x8] sm:$0xff] }
 0x38d   :  { %v562_v47 = vmul.f32 %v1684_v23, %v554_v45  ;;  %1077 = vmatpush.bf16.msra.mxu1 %v2180_v35  ;;  %v2207_v45 = vor.u32 %v1642_v27, %v1562_v37  ;;  %v1520_v27 = vld [vmem:[%s2654_s15 + $0x90] sm:$0xf]  ;;  %vm1259_vm3 = vcmp.ge.f32.partialorder %v2429_v36, 0.0 }
 0x38f   :  { %v570_v49 = vadd.f32 %v1685_v31, %v562_v47  ;;  %v1506_v31 = vld [vmem:[%s2654_s15 + $0x78] sm:$0xf0]  ;;  %v1625_v47 = vld [vmem:[%s2654_s15 + $0x54] sm:$0xf0] }
 0x390   :  { %v1509_v32 = vor.u32 %v1628_v30, %v1506_v31  ;;  %v1464_v30 = vld [vmem:[%s2654_s15 + $0x20] sm:$0xf]  ;;  %v1619_v31 = vld [vmem:[%s2654_s15 + $0x24] sm:$0xf0] }
 0x391   :  { %v572_v50 = vpack.c.bf16 %v570_v49, %v569_v48  ;;  %v1552_v48 = vld [vmem:[%s2654_s15 + $0xd0] sm:$0xf]  ;;  %1078 = vmatpush.bf16.msra.mxu1 %v2207_v45  ;;  %v1489_v49 = vor.u32 %v1625_v47, %v1488_v46  ;;  %v1633_v46 = vld [vmem:[%s2654_s15 + $0x94] sm:$0xf0]  ;;  %v1616_v47 = vld [vmem:[%s2654_s15 + $0x14] sm:$0xf] }
 0x392   :  { %1058 = vmatpush.bf16.msra.mxu2 %v1509_v32  ;;  %v1465_v32 = vor.u32 %v1619_v31, %v1464_v30  ;;  %v1746_v31 = vmov 2  }
 0x393   :  { %688 = vmatmul.bf16.gmra.mxu2 %v572_v50  ;;  %707 = vmatmul.bf16.gmra.mxu1 %v572_v50  ;;  %v1641_v50 = vld [vmem:[%s2654_s15 + $0xd4] sm:$0xf0] }
 0x394   :  { %1022 = vmatpush.bf16.msrb.mxu3 %v1489_v49  ;;  %v1521_v49 = vor.u32 %v1633_v46, %v1520_v27  ;;  %1664 = vset.pattern.permute.xlu0 %v1746_v31 }
 0x396   :  { %1059 = vmatpush.bf16.msra.mxu2 %v1501_v44  ;;  %v1617_v44 = vld [vmem:[%s2654_s15 + $0x14] sm:$0xf0] }
 0x397   :  { %v1457_v37 = vor.u32 %v1617_v44, %v1456_v43 }
 0x400   :  { %v703_v13 = vpop.f32.mrf.mxu1 }
 0x401   :  { %v2108_v3 = vadd.f32 %v703_v13, %v592_v5  ;;  %v1553_v13 = vor.u32 %v1641_v50, %v1552_v48  ;;  %v1458_v48 = vld [vmem:[%s2654_s15 + $0x18] sm:$0xf0] }
 0x402   :  { %v1461_v50 = vor.u32 %v1616_v47, %v1458_v48  ;;  %v1747_v47 = vmov 1  }
 0x403   :  { %v758_v7 = vsel %vm733_vm10, %v2108_v3, -inf  ;;  %v746_v52 = vsel %vm720_vm11, %v2108_v3, -inf  ;;  %1041 = vmatpush.bf16.msra.mxu0 %v1553_v13  ;;  %v2345_v13 = vadd.s32 128, %v2315_v0  ;;  %1666 = vset.pattern.permute.xlu2 %v1747_v47 }
 0x404   :  { %759 = vmax.xlane.f32.xlu1 %v758_v7  ;;  %747 = vmax.xlane.f32.xlu2 %v746_v52  ;;  %v1640_v52 = vld [vmem:[%s2654_s15 + $0xd4] sm:$0xf] }
 0x406   :  { %v684_v54 = vpop.f32.mrf.mxu2 }
 0x407   :  { %v2114_v55 = vadd.f32 %v684_v54, %v591_v53 }
 0x408   :  { %v705_v56 = vpop.f32.mrf.mxu1 }
 0x409   :  { %v734_v57 = vsel %vm733_vm10, %v2114_v55, -inf  ;;  %v721_v58 = vsel %vm720_vm11, %v2114_v55, -inf  ;;  %v2120_v59 = vadd.f32 %v705_v56, %v592_v5  ;;  %v1480_v56 = vld [vmem:[%s2654_s15 + $0x40] sm:$0xf] }
 0x40a   :  { %735 = vmax.xlane.f32.xlu0 %v734_v57  ;;  %v1623_v57 = vld [vmem:[%s2654_s15 + $0x44] sm:$0xf0] }
 0x40b   :  { %v749_v1 = vsel %vm720_vm11, %v2120_v59, -inf  ;;  %v761_v4 = vsel %vm733_vm10, %v2120_v59, -inf }
 0x40c   :  { %722 = vmax.xlane.f32.xlu2 %v721_v58  ;;  %v1544_v58 = vld [vmem:[%s2654_s15 + $0xc0] sm:$0xf] }
 0x40e   :  { %v686_v60 = vpop.f32.mrf.mxu2 }
 0x40f   :  { %v2122_v61 = vadd.f32 %v686_v60, %v591_v53  ;;  %v1481_v60 = vor.u32 %v1623_v57, %v1480_v56  ;;  %v1615_v56 = vld [vmem:[%s2654_s15 + $0x4] sm:$0xf0]  ;;  %v1512_v57 = vld [vmem:[%s2654_s15 + $0x80] sm:$0xf] }
 0x410   :  { %v708_v63 = vpop.f32.mrf.mxu1 }
 0x411   :  { %v737_v2 = vsel %vm733_vm10, %v2122_v61, -inf  ;;  %v2130_v6 = vadd.f32 %v708_v63, %v592_v5  ;;  %v724_v9 = vsel %vm720_vm11, %v2122_v61, -inf  ;;  %v1639_v63 = vld [vmem:[%s2654_s15 + $0xc4] sm:$0xf0]  ;;  %1023 = vmatpush.bf16.msrb.mxu3 %v1481_v60 }
 0x412   :  { %750 = vmax.xlane.f32.xlu0 %v749_v1  ;;  %738 = vmax.xlane.f32.xlu1 %v737_v2  ;;  %v1622_v1 = vld [vmem:[%s2654_s15 + $0x44] sm:$0xf]  ;;  %v1482_v2 = vld [vmem:[%s2654_s15 + $0x48] sm:$0xf0]  ;;  %v1631_v60 = vld [vmem:[%s2654_s15 + $0x84] sm:$0xf0] }
 0x413   :  { %v752_v10 = vsel %vm720_vm11, %v2130_v6, -inf  ;;  %v764_v16 = vsel %vm733_vm10, %v2130_v6, -inf }
 0x414   :  { %762 = vmax.xlane.f32.xlu2 %v761_v4  ;;  %v1545_v4 = vor.u32 %v1639_v63, %v1544_v58  ;;  %v1614_v63 = vld [vmem:[%s2654_s15 + $0x4] sm:$0xf] }
 0x416   :  { %v689_v12 = vpop.f32.mrf.mxu2  ;;  %1042 = vmatpush.bf16.msra.mxu0 %v1545_v4 }
 0x417   :  { %v2132_v8 = vadd.f32 %v689_v12, %v591_v53  ;;  %v1485_v12 = vor.u32 %v1622_v1, %v1482_v2  ;;  %v1450_v1 = vld [vmem:[%s2654_s15 + $0x8] sm:$0xf0]  ;;  %v1513_v2 = vor.u32 %v1631_v60, %v1512_v57 }
 0x418   :  { %v710_v11 = vpop.f32.mrf.mxu1  ;;  %v1453_v4 = vor.u32 %v1614_v63, %v1450_v1 }
 0x419   :  { %v740_v14 = vsel %vm733_vm10, %v2132_v8, -inf  ;;  %v2140_v15 = vadd.f32 %v710_v11, %v592_v5  ;;  %v727_v22 = vsel %vm720_vm11, %v2132_v8, -inf  ;;  %v1490_v5 = vld [vmem:[%s2654_s15 + $0x58] sm:$0xf0]  ;;  %v1472_v11 = vld [vmem:[%s2654_s15 + $0x30] sm:$0xf] }
 0x41a   :  { %725 = vmax.xlane.f32.xlu0 %v724_v9  ;;  %753 = vmax.xlane.f32.xlu1 %v752_v10  ;;  %v1493_v7 = vor.u32 %v1624_v51, %v1490_v5  ;;  %v1638_v9 = vld [vmem:[%s2654_s15 + $0xc4] sm:$0xf]  ;;  %v1546_v10 = vld [vmem:[%s2654_s15 + $0xc8] sm:$0xf0]  ;;  %v1632_v51 = vld [vmem:[%s2654_s15 + $0x94] sm:$0xf] }
 0x41b   :  { %v767_v17 = vsel %vm733_vm10, %v2140_v15, -inf  ;;  %v755_v19 = vsel %vm720_vm11, %v2140_v15, -inf  ;;  %v1522_v5 = vld [vmem:[%s2654_s15 + $0x98] sm:$0xf0] }
 0x41c   :  { %741 = vmax.xlane.f32.xlu2 %v740_v14  ;;  %1060 = vmatpush.bf16.msra.mxu2 %v1493_v7  ;;  %v2264_v14 = vor.u32 %v1638_v9, %v1546_v10  ;;  %v2347_v7 = vor.u32 %v1632_v51, %v1522_v5  ;;  %v1514_v9 = vld [vmem:[%s2654_s15 + $0x88] sm:$0xf0] }
 0x41e   :  { %v691_v18 = vpop.f32.mrf.mxu2 }
 0x41f   :  { %v2148_v20 = vadd.f32 %v691_v18, %v591_v53  ;;  %v1554_v53 = vld [vmem:[%s2654_s15 + $0xd8] sm:$0xf0]  ;;  %v1637_v18 = vld [vmem:[%s2654_s15 + $0xb4] sm:$0xf0] }
 0x420   :  { %v2234_v54 = vor.u32 %v1640_v52, %v1554_v53  ;;  %1061 = vmatpush.bf16.msra.mxu2 %v1485_v12  ;;  %v1448_v53 = vld [vmem:[%s2654_s15] sm:$0xf]  ;;  %v1630_v12 = vld [vmem:[%s2654_s15 + $0x84] sm:$0xf] }
 0x421   :  { %v743_v21 = vsel %vm733_vm10, %v2148_v20, -inf  ;;  %v730_v23 = vsel %vm720_vm11, %v2148_v20, -inf  ;;  %v1449_v58 = vor.u32 %v1615_v56, %v1448_v53  ;;  %v2374_v10 = vor.u32 %v1630_v12, %v1514_v9 }
 0x422   :  { %765 = vmax.xlane.f32.xlu0 %v764_v16  ;;  %768 = vmax.xlane.f32.xlu1 %v767_v17  ;;  %v1621_v16 = vld [vmem:[%s2654_s15 + $0x34] sm:$0xf0]  ;;  %v1536_v17 = vld [vmem:[%s2654_s15 + $0xb0] sm:$0xf] }
 0x423   :  { %1079 = vmatpush.bf16.msra.mxu1 %v2234_v54 }
 0x424   :  { %756 = vmax.xlane.f32.xlu2 %v755_v19  ;;  %v1473_v19 = vor.u32 %v1621_v16, %v1472_v11  ;;  %v2377_v11 = vshra.s32 %v2315_v0, 6  ;;  %v2380_v16 = vshra.s32 %v2345_v13, 6 }
 0x426   :  { %1024 = vmatpush.bf16.msrb.mxu3 %v1473_v19  ;;  %vm770_vm12 = vcmp.eq.s32.totalorder %v2377_v11, 2  ;;  %vm771_vm13 = vcmp.eq.s32.totalorder %v2380_v16, 2  ;;  %vm780_vm14 = vcmp.eq.s32.totalorder %v2377_v11, 1  ;;  %vm781_vm15 = vcmp.eq.s32.totalorder %v2380_v16, 1 }
 0x427   :  { %1080 = vmatpush.bf16.msra.mxu1 %v2264_v14  ;;  %vm790_vm0 = vcmp.eq.s32.totalorder %v2377_v11, 0  ;;  %vm791_vm1 = vcmp.eq.s32.totalorder %v2380_v16, 0 }
 0x42a   :  { %744 = vmax.xlane.f32.xlu0 %v743_v21  ;;  %728 = vmax.xlane.f32.xlu1 %v727_v22  ;;  %v1537_v21 = vor.u32 %v1637_v18, %v1536_v17  ;;  %v1620_v22 = vld [vmem:[%s2654_s15 + $0x34] sm:$0xf] }
 0x42b   :  { %1081 = vmatpush.bf16.msra.mxu1 %v2288_v28  ;;  %1025 = vmatpush.bf16.msrb.mxu3 %v1465_v32 }
 0x42c   :  { %731 = vmax.xlane.f32.xlu2 %v730_v23  ;;  %v1474_v23 = vld [vmem:[%s2654_s15 + $0x38] sm:$0xf0]  ;;  %1043 = vmatpush.bf16.msra.mxu0 %v1537_v21 }
 0x42d   :  { %v1477_v25 = vor.u32 %v1620_v22, %v1474_v23 }
 0x42f   :  { %1062 = vmatpush.bf16.msra.mxu2 %v1477_v25  ;;  %1082 = vmatpush.bf16.msra.mxu1 %v2317_v42  ;;  %v1745_v25 = vmov 3  }
 0x430   :  { %1044 = vmatpush.bf16.msra.mxu0 %v1529_v38  ;;  %1026 = vmatpush.bf16.msrb.mxu3 %v1457_v37 }
 0x431   :  { %1665 = vset.pattern.permute.xlu1 %v1745_v25 }
 0x433   :  { %1063 = vmatpush.bf16.msra.mxu2 %v1469_v39  ;;  %1083 = vmatpush.bf16.msra.mxu1 %v2347_v7 }
 0x434   :  { %1045 = vmatpush.bf16.msra.mxu0 %v1521_v49  ;;  %1027 = vmatpush.bf16.msrb.mxu3 %v1449_v58 }
 0x437   :  { %1064 = vmatpush.bf16.msra.mxu2 %v1461_v50  ;;  %1084 = vmatpush.bf16.msra.mxu1 %v2374_v10  ;;  %v1748_v50 = vmov 0  }
 0x438   :  { %1046 = vmatpush.bf16.msra.mxu0 %v1513_v2  ;;  %1646 = vmatpush.bf16.msra.mxu3 %v2180_v35 }
 0x43b   :  { %1065 = vmatpush.bf16.msra.mxu2 %v1453_v4 }
 0x43c   :  { %1647 = vmatpush.bf16.msra.mxu3 %v2207_v45 }
 0x43e   :  { %1126 = vperm.xlu0 %1664, %v2404_v26  }
 0x440   :  { %1648 = vmatpush.bf16.msra.mxu3 %v2234_v54 }
 0x443   :  { %1145 = vperm.xlu1 %1665, %v2404_v26  }
 0x444   :  { %1649 = vmatpush.bf16.msra.mxu3 %v2264_v14  ;;  %1169 = vperm.xlu2 %1666, %v2404_v26  }
 0x446   :  { %1670 = vset.pattern.permute.xlu0 %v1748_v50 }
 0x447   :  { %1197 = vperm.xlu0 %1670, %v2429_v36  }
 0x448   :  { %1650 = vmatpush.bf16.msra.mxu3 %v2288_v28 }
 0x44b   :  { %1149 = vperm.xlu1 %1665, %v2429_v36  }
 0x44c   :  { %1651 = vmatpush.bf16.msra.mxu3 %v2317_v42  ;;  %1667 = vset.pattern.permute.xlu2 %v1746_v31 }
 0x44d   :  { %1131 = vperm.xlu2 %1667, %v2429_v36  }
 0x44f   :  { %1675 = vset.pattern.permute.xlu0 %v1746_v31 }
 0x450   :  { %1652 = vmatpush.bf16.msra.mxu3 %v2347_v7 }
 0x453   :  { %1669 = vset.pattern.permute.xlu1 %v1747_v47 }
 0x454   :  { %1173 = vperm.xlu1 %1669, %v2429_v36   ;;  %1653 = vmatpush.bf16.msra.mxu3 %v2374_v10 }
 0x455   :  { %1668 = vset.pattern.permute.xlu2 %v1748_v50 }
 0x456   :  { %1193 = vperm.xlu2 %1668, %v2404_v26  }
 0x45c   :  { %1672 = vset.pattern.permute.xlu1 %v1745_v25 }
 0x45e   :  { %1671 = vset.pattern.permute.xlu2 %v1746_v31 }
 0x477   :  { %v748_v52 = vpop.xlane.xlu2 %747  ;;  %v760_v17 = vpop.xlane.xlu1 %759 }
 0x478   :  { %v772_v21 = vsel %vm770_vm12, %v748_v52, %v760_v17  ;;  %v773_v22 = vsel %vm771_vm13, %v748_v52, %v760_v17 }
 0x47d   :  { %v736_v18 = vpop.xlane.xlu0 %735 }
 0x47e   :  { %v782_v35 = vsel %vm780_vm14, %v736_v18, %v772_v21  ;;  %v783_v23 = vsel %vm781_vm15, %v736_v18, %v773_v22  ;;  %v2488_v22 = vld [vmem:[%s2655_s2 + $0x10] sm:$0xff] }
 0x47f   :  { %v723_v19 = vpop.xlane.xlu2 %722  ;;  %1153 = vperm.xlu1 %1672, %v2488_v22   ;;  %1136 = vperm.xlu2 %1671, %v2488_v22   ;;  %vm1260_vm5 = vcmp.ge.f32.partialorder %v2488_v22, 0.0 }
 0x480   :  { %v2408_v29 = vsel %vm790_vm0, %v723_v19, %v782_v35  ;;  %v2413_v30 = vsel %vm791_vm1, %v723_v19, %v783_v23  ;;  %v2493_v35 = vld [vmem:[%s2655_s2 + $0x18] sm:$0xff] }
 0x481   :  { %v800_v62 = vsub.f32 %v2114_v55, %v2408_v29  ;;  %v801_v32 = vsub.f32 %v2108_v3, %v2413_v30  ;;  %1141 = vperm.xlu0 %1675, %v2493_v35   ;;  %vm1261_vm6 = vcmp.ge.f32.partialorder %v2493_v35, 0.0 }
 0x483   :  { %v808_v14 = vmul.f32 1.442695, %v800_v62  ;;  %v810_v43 = vmul.f32 1.442695, %v801_v32 }
 0x485   :  { %v751_v45 = vpop.xlane.xlu0 %750  ;;  %v739_v24 = vpop.xlane.xlu1 %738  ;;  %1712 = vpow2.f32 %v808_v14 }
 0x486   :  { %1714 = vpow2.f32 %v810_v43 }
 0x487   :  { %v763_v54 = vpop.xlane.xlu2 %762  ;;  %1674 = vset.pattern.permute.xlu1 %v1748_v50  ;;  %1673 = vset.pattern.permute.xlu2 %v1747_v47 }
 0x488   :  { %v774_v33 = vsel %vm770_vm12, %v751_v45, %v763_v54  ;;  %v775_v34 = vsel %vm771_vm13, %v751_v45, %v763_v54  ;;  %1201 = vperm.xlu1 %1674, %v2488_v22   ;;  %1177 = vperm.xlu2 %1673, %v2488_v22  }
 0x489   :  { %v784_v39 = vsel %vm780_vm14, %v739_v24, %v774_v33  ;;  %v785_v40 = vsel %vm781_vm15, %v739_v24, %v775_v34  ;;  %1679 = vset.pattern.permute.xlu0 %v1748_v50 }
 0x48b   :  { %v1713_v42 = vpop.eup %1712 }
 0x48c   :  { %v1715_v53 = vpop.eup %1714 }
 0x48d   :  { %v726_v38 = vpop.xlane.xlu0 %725  ;;  %v754_v41 = vpop.xlane.xlu1 %753 }
 0x48e   :  { %v2438_v44 = vsel %vm790_vm0, %v726_v38, %v784_v39  ;;  %v2442_v27 = vsel %vm791_vm1, %v726_v38, %v785_v40 }
 0x48f   :  { %v802_v28 = vsub.f32 %v2122_v61, %v2438_v44  ;;  %v803_v37 = vsub.f32 %v2120_v59, %v2442_v27  ;;  %v742_v46 = vpop.xlane.xlu2 %741 }
 0x490   :  { %1677 = vset.pattern.permute.xlu1 %v1747_v47  ;;  %1676 = vset.pattern.permute.xlu2 %v1745_v25 }
 0x491   :  { %v812_v48 = vmul.f32 1.442695, %v802_v28  ;;  %v814_v49 = vmul.f32 1.442695, %v803_v37  ;;  %1181 = vperm.xlu1 %1677, %v2493_v35   ;;  %1157 = vperm.xlu2 %1676, %v2493_v35  }
 0x493   :  { %1716 = vpow2.f32 %v812_v48 }
 0x494   :  { %1718 = vpow2.f32 %v814_v49 }
 0x495   :  { %v766_v51 = vpop.xlane.xlu0 %765  ;;  %v769_v5 = vpop.xlane.xlu1 %768 }
 0x496   :  { %v776_v57 = vsel %vm770_vm12, %v754_v41, %v766_v51  ;;  %v777_v7 = vsel %vm771_vm13, %v754_v41, %v766_v51 }
 0x497   :  { %v757_v52 = vpop.xlane.xlu2 %756  ;;  %v786_v1 = vsel %vm780_vm14, %v742_v46, %v776_v57  ;;  %v787_v9 = vsel %vm781_vm15, %v742_v46, %v777_v7 }
 0x498   :  { %v778_v2 = vsel %vm770_vm12, %v757_v52, %v769_v5  ;;  %v779_v4 = vsel %vm771_vm13, %v757_v52, %v769_v5 }
 0x499   :  { %v1717_v56 = vpop.eup %1716  ;;  %1678 = vset.pattern.permute.xlu2 %v1748_v50 }
 0x49a   :  { %v1719_v58 = vpop.eup %1718  ;;  %v824_v60 = vpack.c.bf16 %v1717_v56, %v1713_v42  ;;  %1205 = vperm.xlu2 %1678, %v2493_v35  }
 0x49b   :  { %v825_v63 = vpack.c.bf16 %v1719_v58, %v1715_v53 }
 0x49c   :  { %1028 = vmatmul.bf16.vlgmr.msrb.gmra.mxu3 %v824_v60  ;;  %1066 = vmatmul.bf16.vlgmr.msra.gmra.mxu2 %v824_v60  ;;  %v1749_v60 = vmov 0.0  }
 0x49d   :  { %1047 = vmatmul.bf16.vlgmr.msra.gmra.mxu0 %v825_v63  ;;  %1085 = vmatmul.bf16.vlgmr.msra.gmra.mxu1 %v825_v63  ;;  %v745_v12 = vpop.xlane.xlu0 %744  ;;  %v729_v10 = vpop.xlane.xlu1 %728  ;;  %v1574_v63 = vsel %vm1258_vm2, 1.0, %v1749_v60 }
 0x49e   :  { %v788_v17 = vsel %vm780_vm14, %v745_v12, %v778_v2  ;;  %v789_v18 = vsel %vm781_vm15, %v745_v12, %v779_v4  ;;  %v2479_v19 = vsel %vm790_vm0, %v729_v10, %v786_v1  ;;  %v2483_v21 = vsel %vm791_vm1, %v729_v10, %v787_v9 }
 0x49f   :  { %v804_v23 = vsub.f32 %v2132_v8, %v2479_v19  ;;  %v805_v45 = vsub.f32 %v2130_v6, %v2483_v21  ;;  %v732_v24 = vpop.xlane.xlu2 %731  ;;  %v1575_v4 = vsel %vm1259_vm3, 1.0, %v1749_v60  ;;  %v1576_v12 = vsel %vm1260_vm5, 1.0, %v1749_v60 }
 0x4a0   :  { %v2503_v54 = vsel %vm790_vm0, %v732_v24, %v788_v17  ;;  %v2507_v62 = vsel %vm791_vm1, %v732_v24, %v789_v18  ;;  %v1271_v26 = vsel %vm1270_vm4, %v1574_v63, 0.0  ;;  %v1577_v10 = vsel %vm1261_vm6, 1.0, %v1749_v60 }
 0x4a1   :  { %v816_v32 = vmul.f32 1.442695, %v804_v23  ;;  %v818_v33 = vmul.f32 1.442695, %v805_v45  ;;  %v806_v34 = vsub.f32 %v2148_v20, %v2503_v54  ;;  %v807_v14 = vsub.f32 %v2140_v15, %v2507_v62 }
 0x4a2   :  { %v1272_v17 = vsel %vm1270_vm4, %v1575_v4, 0.0  ;;  %v1274_v18 = vsel %vm1270_vm4, %v1576_v12, 0.0  ;;  %v1276_v24 = vsel %vm1270_vm4, %v1577_v10, 0.0 }
 0x4a3   :  { %1720 = vpow2.f32 %v816_v32  ;;  %v820_v38 = vmul.f32 1.442695, %v806_v34  ;;  %v822_v39 = vmul.f32 1.442695, %v807_v14  ;;  %v1273_v23 = vadd.f32 %v1272_v17, %v1271_v26 }
 0x4a4   :  { %1722 = vpow2.f32 %v818_v33 }
 0x4a5   :  { %1724 = vpow2.f32 %v820_v38  ;;  %v1275_v33 = vadd.f32 %v1274_v18, %v1273_v23 }
 0x4a6   :  { %1726 = vpow2.f32 %v822_v39 }
 0x4a7   :  { %v1170_v31 = vpop.permute.xlu2 %1169  ;;  %v1277_v35 = vadd.f32 %v1276_v24, %v1275_v33 }
 0x4a9   :  { %v1721_v40 = vpop.eup %1720 }
 0x4aa   :  { %v1723_v41 = vpop.eup %1722 }
 0x4ab   :  { %v1725_v43 = vpop.eup %1724  ;;  %1278 = vadd.xlane.f32.xlu0 %v1277_v35 }
 0x4ac   :  { %v1727_v28 = vpop.eup %1726  ;;  %v826_v37 = vpack.c.bf16 %v1725_v43, %v1721_v40 }
 0x4ad   :  { %v827_v46 = vpack.c.bf16 %v1727_v28, %v1723_v41 }
 0x4ae   :  { %1033 = vmatmul.bf16.gmra.mxu3 %v826_v37  ;;  %1071 = vmatmul.bf16.gmra.mxu2 %v826_v37 }
 0x4af   :  { %1052 = vmatmul.bf16.gmra.mxu0 %v827_v46  ;;  %v2529_v49 = vpop.permute.xlu2 %1131 }
 0x4b0   :  { %v1127_v14 = vpop.permute.xlu0 %1126 }
 0x4b5   :  { %v1146_v48 = vpop.permute.xlu1 %1145 }
 0x4b6   :  { %v1160_v28 = vsel %vm770_vm12, %v1127_v14, %v1146_v48  ;;  %v1161_v37 = vsel %vm771_vm13, %v1127_v14, %v1146_v48 }
 0x4b7   :  { %v2533_v52 = vpop.permute.xlu2 %1193 }
 0x4bd   :  { %v2531_v42 = vpop.permute.xlu1 %1149 }
 0x4be   :  { %1090 = vmatmul.bf16.vlgmr.msra.gmra.mxu3 %v827_v46  ;;  %v1162_v63 = vsel %vm770_vm12, %v2529_v49, %v2531_v42 }
 0x4c6   :  { %v2540_v1 = vpop.permute.xlu1 %1173 }
 0x4c7   :  { %v1186_v10 = vsel %vm780_vm14, %v2540_v1, %v1162_v63 }
 0x4d9   :  { %v2537_v7 = vpop.permute.xlu2 %1136 }
 0x4e2   :  { %v1178_v43 = vpop.permute.xlu2 %1177 }
 0x4f1   :  { %v1154_v39 = vpop.permute.xlu1 %1153 }
 0x4f2   :  { %v1164_v17 = vsel %vm770_vm12, %v2537_v7, %v1154_v39 }
 0x51a   :  { %v1048_v5 = vpop.f32.mrf.mxu0  ;;  %v1086_v25 = vpop.f32.mrf.mxu1 }
 0x51f   :  { %v1029_v51 = vpop.f32.mrf.mxu3  ;;  %v1067_v47 = vpop.f32.mrf.mxu2 }
 0x520   :  { %v1049_v57 = vadd.f32 %v1048_v5, %v1029_v51  ;;  %v1087_v58 = vadd.f32 %v1086_v25, %v1067_v47  ;;  %v718_v5 = vand.u32 63, %v2315_v0  ;;  %v719_v47 = vand.u32 63, %v2345_v13  ;;  %v1198_v13 = vpop.permute.xlu0 %1197 }
 0x521   :  { %v1210_v24 = vsel %vm790_vm0, %v1198_v13, %v1186_v10 }
 0x522   :  { %v1050_v56 = vpop.f32.mrf.mxu0  ;;  %1728 = vlog2.f32 %v1049_v57  ;;  %v1088_v22 = vpop.f32.mrf.mxu1  ;;  %v1185_v57 = vsel %vm781_vm15, %v1170_v31, %v1161_v37  ;;  %v2563_v12 = vcvt.s32.f32 %v718_v5 }
 0x523   :  { %1730 = vlog2.f32 %v1087_v58 }
 0x524   :  { %vm1220_vm9 = vcmp.eq.f32.partialorder %v2563_v12, %v1210_v24 }
 0x527   :  { %v1031_v53 = vpop.f32.mrf.mxu3  ;;  %v1069_v9 = vpop.f32.mrf.mxu2 }
 0x528   :  { %v1051_v50 = vadd.f32 %v1050_v56, %v1031_v53  ;;  %v1089_v45 = vadd.f32 %v1088_v22, %v1069_v9  ;;  %v1729_v34 = vpop.eup %1728  ;;  %v1184_v56 = vsel %vm780_vm14, %v1170_v31, %v1160_v28  ;;  %v2565_v9 = vcvt.s32.f32 %v719_v47 }
 0x529   :  { %v1731_v38 = vpop.eup %1730  ;;  %v1097_v46 = vmul.f32 0.6931472, %v1729_v34  ;;  %v1208_v31 = vsel %vm790_vm0, %v2533_v52, %v1184_v56 }
 0x52a   :  { %1732 = vlog2.f32 %v1051_v50  ;;  %v1099_v51 = vmul.f32 0.6931472, %v1731_v38  ;;  %vm1218_vm7 = vcmp.eq.f32.partialorder %v2563_v12, %v1208_v31  ;;  %v1142_v38 = vpop.permute.xlu0 %1141 }
 0x52b   :  { %1734 = vlog2.f32 %v1089_v45  ;;  %v1112_v60 = vadd.f32 %v1097_v46, %v2408_v29  ;;  %v1209_v29 = vsel %vm791_vm1, %v2533_v52, %v1185_v57 }
 0x52c   :  { %v1053_v36 = vpop.f32.mrf.mxu0  ;;  %v1113_v48 = vadd.f32 %v1099_v51, %v2413_v30  ;;  %v1163_v30 = vsel %vm771_vm13, %v2529_v49, %v2531_v42  ;;  %v1202_v49 = vpop.permute.xlu1 %1201  ;;  %vm1219_vm8 = vcmp.eq.f32.partialorder %v2565_v9, %v1209_v29 }
 0x52d   :  { %v1226_v52 = vsub.f32 %v1112_v60, %v2114_v55  ;;  %v1158_v42 = vpop.permute.xlu2 %1157  ;;  %v1187_v55 = vsel %vm781_vm15, %v2540_v1, %v1163_v30 }
 0x52e   :  { %v1227_v22 = vsub.f32 %v1113_v48, %v2108_v3  ;;  %v1165_v3 = vsel %vm771_vm13, %v2537_v7, %v1154_v39  ;;  %v1211_v1 = vsel %vm791_vm1, %v1198_v13, %v1187_v55 }
 0x52f   :  { %v1234_v33 = vsel %vm1218_vm7, %v1226_v52, 0.0  ;;  %v1189_v7 = vsel %vm781_vm15, %v1178_v43, %v1165_v3  ;;  %vm1221_vm10 = vcmp.eq.f32.partialorder %v2565_v9, %v1211_v1 }
 0x530   :  { %v1733_v41 = vpop.eup %1732  ;;  %v1235_v34 = vsel %vm1219_vm8, %v1227_v22, 0.0 }
 0x531   :  { %v1034_v2 = vpop.f32.mrf.mxu3  ;;  %v1101_v53 = vmul.f32 0.6931472, %v1733_v41  ;;  %v1735_v50 = vpop.eup %1734  ;;  %v1242_v37 = vadd.f32 %v1235_v34, %v1234_v33 }
 0x532   :  { %v1054_v32 = vadd.f32 %v1053_v36, %v1034_v2  ;;  %v1072_v2 = vpop.f32.mrf.mxu2  ;;  %v1103_v23 = vmul.f32 0.6931472, %v1735_v50  ;;  %v1279_v22 = vpop.xlane.xlu0 %1278 }
 0x533   :  { %v1114_v26 = vadd.f32 %v1101_v53, %v2438_v44 }
 0x534   :  { %1736 = vlog2.f32 %v1054_v32  ;;  %v1055_v25 = vpop.f32.mrf.mxu0  ;;  %v1188_v32 = vsel %vm780_vm14, %v1178_v43, %v1164_v17  ;;  %v1213_v43 = vsel %vm791_vm1, %v1202_v49, %v1189_v7 }
 0x535   :  { %v1228_v44 = vsub.f32 %v1114_v26, %v2122_v61  ;;  %v1115_v61 = vadd.f32 %v1103_v23, %v2442_v27  ;;  %v1212_v27 = vsel %vm790_vm0, %v1202_v49, %v1188_v32 }
 0x536   :  { %vm1222_vm11 = vcmp.eq.f32.partialorder %v2563_v12, %v1212_v27 }
 0x537   :  { %v1229_v51 = vsub.f32 %v1115_v61, %v2120_v59 }
 0x539   :  { %v1036_v40 = vpop.f32.mrf.mxu3  ;;  %v1237_v50 = vsel %vm1221_vm10, %v1229_v51, 0.0 }
 0x53a   :  { %v1056_v58 = vadd.f32 %v1055_v25, %v1036_v40  ;;  %v1737_v4 = vpop.eup %1736  ;;  %v1236_v40 = vsel %vm1220_vm9, %v1228_v44, 0.0  ;;  %v1074_v39 = vpop.f32.mrf.mxu2 }
 0x53b   :  { %v1105_v45 = vmul.f32 0.6931472, %v1737_v4  ;;  %v1182_v25 = vpop.permute.xlu1 %1181  ;;  %v1243_v56 = vadd.f32 %v1242_v37, %v1236_v40 }
 0x53c   :  { %1738 = vlog2.f32 %v1056_v58  ;;  %v1167_v58 = vsel %vm771_vm13, %v1142_v38, %v1158_v42 }
 0x53d   :  { %v1116_v14 = vadd.f32 %v1105_v45, %v2479_v19  ;;  %v1166_v19 = vsel %vm770_vm12, %v1142_v38, %v1158_v42  ;;  %v1244_v13 = vadd.f32 %v1243_v56, %v1237_v50  ;;  %vm1223_vm12 = vcmp.eq.f32.partialorder %v2565_v9, %v1213_v43 }
 0x53e   :  { %v1190_v59 = vsel %vm780_vm14, %v1182_v25, %v1166_v19  ;;  %v1191_v29 = vsel %vm781_vm15, %v1182_v25, %v1167_v58  ;;  %vm1288_vm15 = vcmp.eq.s32.totalorder %v2315_v0, 1 }
 0x53f   :  { %v1230_v47 = vsub.f32 %v1116_v14, %v2132_v8  ;;  %v1206_v8 = vpop.permute.xlu2 %1205 }
 0x541   :  { %v1091_v36 = vpop.f32.mrf.mxu3  ;;  %v1238_v48 = vsel %vm1222_vm11, %v1230_v47, 0.0 }
 0x542   :  { %v1092_v18 = vadd.f32 %v1091_v36, %v1072_v2  ;;  %v1739_v35 = vpop.eup %1738  ;;  %v1245_v31 = vadd.f32 %v1244_v13, %v1238_v48 }
 0x543   :  { %v1109_v5 = vmul.f32 0.6931472, %v1739_v35 }
 0x544   :  { %1740 = vlog2.f32 %v1092_v18 }
 0x545   :  { %v1118_v60 = vadd.f32 %v1109_v5, %v2503_v54 }
 0x547   :  { %v1232_v30 = vsub.f32 %v1118_v60, %v2148_v20  ;;  %v1280_v20 = vrot.slane %v1279_v22, 4 }
 0x549   :  { %v1093_v41 = vpop.f32.mrf.mxu3  ;;  %v1281_v23 = vadd.f32 %v1280_v20, %v1279_v22 }
 0x54a   :  { %v1741_v28 = vpop.eup %1740  ;;  %v1094_v46 = vadd.f32 %v1093_v41, %v1074_v39 }
 0x54b   :  { %v1107_v53 = vmul.f32 0.6931472, %v1741_v28  ;;  %v1282_v45 = vrot.slane %v1281_v23, 2 }
 0x54c   :  { %1742 = vlog2.f32 %v1094_v46 }
 0x54d   :  { %v1117_v57 = vadd.f32 %v1107_v53, %v2483_v21  ;;  %v1214_v21 = vsel %vm790_vm0, %v1206_v8, %v1190_v59  ;;  %v1283_v16 = vadd.f32 %v1282_v45, %v1281_v23  ;;  %vm1287_vm0 = vcmp.eq.s32.totalorder %v2315_v0, 0 }
 0x54e   :  { %vm1224_vm13 = vcmp.eq.f32.partialorder %v2563_v12, %v1214_v21 }
 0x54f   :  { %v1231_v63 = vsub.f32 %v1117_v57, %v2130_v6  ;;  %v1215_v6 = vsel %vm791_vm1, %v1206_v8, %v1191_v29  ;;  %v1240_v10 = vsel %vm1224_vm13, %v1232_v30, 0.0 }
 0x550   :  { %vm1225_vm14 = vcmp.eq.f32.partialorder %v2565_v9, %v1215_v6 }
 0x551   :  { %v1239_v2 = vsel %vm1223_vm12, %v1231_v63, 0.0 }
 0x552   :  { %v1743_v4 = vpop.eup %1742  ;;  %v1246_v54 = vadd.f32 %v1245_v31, %v1239_v2 }
 0x553   :  { %v1111_v26 = vmul.f32 0.6931472, %v1743_v4 }
 0x554   :  { %v1247_v17 = vadd.f32 %v1246_v54, %v1240_v10 }
 0x555   :  { %v1119_v36 = vadd.f32 %v1111_v26, %v2507_v62  ;;  %v1284_v62 = vrot.slane %v1283_v16, 1 }
 0x557   :  { %v1233_v11 = vsub.f32 %v1119_v36, %v2140_v15  ;;  %v1285_v15 = vadd.f32 %v1284_v62, %v1283_v16 }
 0x559   :  { %v1241_v18 = vsel %vm1225_vm14, %v1233_v11, 0.0 }
 0x55a   :  { %v1248_v52 = vadd.f32 %v1247_v17, %v1241_v18 }
 0x55c   :  { %1249 = vadd.xlane.f32.xlu1 %v1248_v52 }
 0x5cf   :  { %v1250_v12 = vpop.xlane.xlu1 %1249 }
 0x5d0   :  { %v1251_v49 = vrot.slane %v1250_v12, 4 }
 0x5d2   :  { %v1252_v42 = vadd.f32 %v1251_v49, %v1250_v12 }
 0x5d4   :  { %v1253_v44 = vrot.slane %v1252_v42, 2 }
 0x5d6   :  { %v1254_v24 = vadd.f32 %v1253_v44, %v1252_v42 }
 0x5d8   :  { %v1255_v55 = vrot.slane %v1254_v24, 1 }
 0x5da   :  { %v1256_v3 = vadd.f32 %v1255_v55, %v1254_v24 }
 0x5dc   :  { %1654 = vpush %v1256_v3 }
 0x5dd   :  { %1656 = vpush %v1285_v15 }
 0x60d   :  { %s1655_s2 = spop %1654 }
 0x60e   :  { %v1291_v9 = vstv %s1655_s2  ;;  %s1657_s22 = spop %1656 }
 0x60f   :  { %v1289_v32 = vstv %s1657_s22 }
 0x610   :  { %v1290_v33 = vsel %vm1288_vm15, %v1289_v32, 0.0 }
 0x611   :  { %v1292_v34 = vsel %vm1287_vm0, %v1291_v9, %v1290_v33 }
 0x612   :  { %1293 = vst [vmem:[%s2656_s16] sm:$0x1] %v1292_v34 }

</bundles_post_ra>
